<compile_context>
chip_gen: v5e
topology: v5e:2x2
jax: 0.10.0
libtpu: 0.0.40
codegen_flags: <defaults>
</compile_context>

<pallas_src>
import functools
import math

import jax
import jax.numpy as jnp
from jax import lax
from jax.experimental import pallas as pl
from jax.experimental.pallas import tpu as pltpu

MAX_NUM_CLASS = 2
FREQ = 2           # self.freq
IND = 0            # self.ind
LN_EPS = 1e-5
MASK_NEG = -1e30   # additive causal bias; scores stay f32 so this is safe


def _layernorm(x, w, b):
    mu = jnp.mean(x, axis=-1, keepdims=True)
    var = jnp.mean((x - mu) ** 2, axis=-1, keepdims=True)
    return (x - mu) * lax.rsqrt(var + LN_EPS) * w + b


def _gelu_tanh(x):
    # GPT-2 "new" GELU (tanh approximation) -> EUP tanh, free-ish slot
    return 0.5 * x * (1.0 + jnp.tanh(0.7978845608028654 * (x + 0.044715 * x * x * x)))


# ----------------------- Pallas tied-backbone kernel -------------------------
def _tied_backbone_kernel(n_head,
                          x_ref, wpe_ref, bias_ref,
                          ln1_w_ref, ln1_b_ref,
                          qkv_w_ref, qkv_b_ref,
                          proj_w_ref, proj_b_ref,
                          ln2_w_ref, ln2_b_ref,
                          fc_w_ref, fc_b_ref,
                          mproj_w_ref, mproj_b_ref,
                          lnf_w_ref, lnf_b_ref,
                          out_ref, state_ref):
    T, D = state_ref.shape
    hd = D // n_head
    scale = 1.0 / math.sqrt(hd)
    rep = pl.program_id(1)

    @pl.when(rep == 0)
    def _():
        state_ref[...] = x_ref[...].astype(jnp.float32)

    # ---- one full GPT2Model forward of the single (tied) layer ----
    # wpe is added on every backbone call (matches self.f(output) in the ref).
    h = state_ref[...] + wpe_ref[...]

    # ---- causal self-attention (heads batched via 3-D dot_general) ----
    xn = _layernorm(h, ln1_w_ref[...], ln1_b_ref[...])
    qkv = jnp.dot(xn.astype(jnp.bfloat16), qkv_w_ref[...],
                  preferred_element_type=jnp.float32) + qkv_b_ref[...]
    q = qkv[:, 0:D] * scale          # fold 1/sqrt(hd) into q (O(T*D))
    k = qkv[:, D:2 * D]
    v = qkv[:, 2 * D:3 * D]

    # head-major [H, T, hd]: lane slices stacked on a new (untiled) leading axis
    qh = jnp.stack([q[:, i * hd:(i + 1) * hd] for i in range(n_head)],
                   axis=0).astype(jnp.bfloat16)
    kh = jnp.stack([k[:, i * hd:(i + 1) * hd] for i in range(n_head)],
                   axis=0).astype(jnp.bfloat16)
    vh = jnp.stack([v[:, i * hd:(i + 1) * hd] for i in range(n_head)],
                   axis=0).astype(jnp.bfloat16)

    s = jnp.einsum('hqd,hkd->hqk', qh, kh,
                   preferred_element_type=jnp.float32)      # [H, T, T], f32
    s = s + bias_ref[...]                                   # additive causal bias
    s = s - jnp.max(s, axis=-1, keepdims=True)
    p = jnp.exp(s)
    p = p * pl.reciprocal(jnp.sum(p, axis=-1, keepdims=True), approx=True)
    o = jnp.einsum('hqk,hkd->hqd', p.astype(jnp.bfloat16), vh,
                   preferred_element_type=jnp.float32)      # [H, T, hd]

    attn = jnp.concatenate([o[i] for i in range(n_head)], axis=-1)   # [T, D]
    attn = jnp.dot(attn.astype(jnp.bfloat16), proj_w_ref[...],
                   preferred_element_type=jnp.float32) + proj_b_ref[...]
    h = h + attn

    # ---- MLP ----
    xn2 = _layernorm(h, ln2_w_ref[...], ln2_b_ref[...])
    mid = jnp.dot(xn2.astype(jnp.bfloat16), fc_w_ref[...],
                  preferred_element_type=jnp.float32) + fc_b_ref[...]
    mid = _gelu_tanh(mid)
    mlp = jnp.dot(mid.astype(jnp.bfloat16), mproj_w_ref[...],
                  preferred_element_type=jnp.float32) + mproj_b_ref[...]
    h = h + mlp

    # final LayerNorm of the backbone (applied on every repetition)
    h = _layernorm(h, lnf_w_ref[...], lnf_b_ref[...])

    state_ref[...] = h

    @pl.when(rep == pl.num_programs(1) - 1)
    def _():
        out_ref[...] = h.astype(out_ref.dtype)


def _const_index_map(ndim, *_grid_indices):
    return (0,) * ndim


def tied_gpt2_backbone(x, params, n_head, n_reps):
    """Apply the single-layer GPT-2 backbone (wpe add + block + ln_f) n_reps times."""
    B, T, D = x.shape
    if n_reps == 0:
        return x

    wpe = params["wpe"][:T].astype(jnp.float32)
    row = jnp.arange(T, dtype=jnp.int32)[:, None]
    col = jnp.arange(T, dtype=jnp.int32)[None, :]
    causal_bias = jnp.where(col <= row, 0.0, MASK_NEG).astype(jnp.float32)

    def r2(v):                       # 1-D params -> [1, X] f32 (TPU-friendly 2-D)
        return v.reshape(1, -1).astype(jnp.float32)

    def bf16(v):
        return v.astype(jnp.bfloat16)

    weight_args = (
        wpe, causal_bias,
        r2(params["ln1_w"]), r2(params["ln1_b"]),
        bf16(params["qkv_w"]), r2(params["qkv_b"]),
        bf16(params["proj_w"]), r2(params["proj_b"]),
        r2(params["ln2_w"]), r2(params["ln2_b"]),
        bf16(params["fc_w"]), r2(params["fc_b"]),
        bf16(params["mproj_w"]), r2(params["mproj_b"]),
        r2(params["lnf_w"]), r2(params["lnf_b"]),
    )

    in_specs = [pl.BlockSpec((None, T, D), lambda b, r: (b, 0, 0))]
    in_specs += [pl.BlockSpec(a.shape, functools.partial(_const_index_map, a.ndim))
                 for a in weight_args]

    kernel = functools.partial(_tied_backbone_kernel, n_head)
    return pl.pallas_call(
        kernel,
        out_shape=jax.ShapeDtypeStruct((B, T, D), jnp.float32),
        grid_spec=pltpu.PrefetchScalarGridSpec(
            num_scalar_prefetch=0,
            grid=(B, n_reps),        # (batch: parallel, tied repetitions: arbitrary)
            in_specs=in_specs,
            out_specs=pl.BlockSpec((None, T, D), lambda b, r: (b, 0, 0)),
            scratch_shapes=[pltpu.VMEM((T, D), jnp.float32)],   # residual carry
        ),
        compiler_params=pltpu.CompilerParams(
            dimension_semantics=("parallel", "arbitrary"),
            # explicit scoped-VMEM request: above v5e/v6e defaults, headroom
            # below v7x's 64 MiB physical VMEM
            vmem_limit_bytes=48 * 1024 * 1024,
        ),
    )(x, *weight_args)


# ----------------------------- full forward ----------------------------------
def combine(xs, ys):
    """xs: [B, n, d], ys: [B, n] -> zs: [B, 2n, d] (x/y interleaved)."""
    B, n, d = xs.shape
    ys_wide = jnp.concatenate(
        [ys[:, :, None], jnp.zeros((B, n, d - 1), xs.dtype)], axis=2)
    zs = jnp.stack([xs, ys_wide], axis=2).reshape(B, FREQ * n, d)
    return zs


def transformer_model_tying_forward(params, xs, ys, add_inputs_embeds=False,
                                    *, n_layer, n_head):
    del add_inputs_embeds  # accepted for API parity; unused by self.f() in the reference
    zs = combine(xs, ys)                                          # [B, 2n, d]
    embeds = zs @ params["read_in_w"] + params["read_in_b"]       # [B, 2n, D]
    output = tied_gpt2_backbone(embeds, params, n_head, n_layer)  # tied repeats
    prediction = output @ params["read_out_w"] + params["read_out_b"]
    y = prediction[:, IND::FREQ, 0]                               # regression head
    return y


# ------------------------------ param init -----------------------------------
def init_params(key, n_dims, n_positions, n_embd):
    D = n_embd
    block_size = FREQ * n_positions + 1
    ks = jax.random.split(key, 8)
    std = 0.02
    return {
        "read_in_w": jax.random.normal(ks[0], (n_dims, D), jnp.float32) * std,
        "read_in_b": jnp.zeros((D,), jnp.float32),
        "wpe": jax.random.normal(ks[1], (block_size, D), jnp.float32) * std,
        "ln1_w": jnp.ones((D,), jnp.float32),
        "ln1_b": jnp.zeros((D,), jnp.float32),
        "qkv_w": jax.random.normal(ks[2], (D, 3 * D), jnp.float32) * std,
        "qkv_b": jnp.zeros((3 * D,), jnp.float32),
        "proj_w": jax.random.normal(ks[3], (D, D), jnp.float32) * std,
        "proj_b": jnp.zeros((D,), jnp.float32),
        "ln2_w": jnp.ones((D,), jnp.float32),
        "ln2_b": jnp.zeros((D,), jnp.float32),
        "fc_w": jax.random.normal(ks[4], (D, 4 * D), jnp.float32) * std,
        "fc_b": jnp.zeros((4 * D,), jnp.float32),
        "mproj_w": jax.random.normal(ks[5], (4 * D, D), jnp.float32) * std,
        "mproj_b": jnp.zeros((D,), jnp.float32),
        "lnf_w": jnp.ones((D,), jnp.float32),
        "lnf_b": jnp.zeros((D,), jnp.float32),
        "read_out_w": jax.random.normal(ks[6], (D, 1), jnp.float32) * std,
        "read_out_b": jnp.zeros((1,), jnp.float32),
    }


# --------------------------------- main ---------------------------------------
if __name__ == "__main__":
    B, n_positions, n_dims = 2, 8, 4
    n_embd, n_layer, n_head = 128, 4, 4   # tied single layer applied n_layer times

    key = jax.random.PRNGKey(0)
    k_param, k_x, k_y = jax.random.split(key, 3)

    params = init_params(k_param, n_dims, n_positions, n_embd)
    xs = jax.random.normal(k_x, (B, n_positions, n_dims), jnp.float32)
    ys = jax.random.normal(k_y, (B, n_positions), jnp.float32)

    y = transformer_model_tying_forward(params, xs, ys, False,
                                        n_layer=n_layer, n_head=n_head)
    y = jax.block_until_ready(y)
    assert y.shape == (B, n_positions), y.shape
    assert bool(jnp.all(jnp.isfinite(y)))
    print("KERNEL_OK")
</pallas_src>

<mosaic_0001>
module attributes {stable_mosaic.version = 11 : i64} {
  func.func @_tied_backbone_kernel(%arg0: i32, %arg1: i32, %arg2: memref<1x16x128xf32, #tpu.memory_space<vmem>>, %arg3: memref<16x128xf32, #tpu.memory_space<vmem>>, %arg4: memref<16x16xf32, #tpu.memory_space<vmem>>, %arg5: memref<1x128xf32, #tpu.memory_space<vmem>>, %arg6: memref<1x128xf32, #tpu.memory_space<vmem>>, %arg7: memref<128x384xbf16, #tpu.memory_space<vmem>>, %arg8: memref<1x384xf32, #tpu.memory_space<vmem>>, %arg9: memref<128x128xbf16, #tpu.memory_space<vmem>>, %arg10: memref<1x128xf32, #tpu.memory_space<vmem>>, %arg11: memref<1x128xf32, #tpu.memory_space<vmem>>, %arg12: memref<1x128xf32, #tpu.memory_space<vmem>>, %arg13: memref<128x512xbf16, #tpu.memory_space<vmem>>, %arg14: memref<1x512xf32, #tpu.memory_space<vmem>>, %arg15: memref<512x128xbf16, #tpu.memory_space<vmem>>, %arg16: memref<1x128xf32, #tpu.memory_space<vmem>>, %arg17: memref<1x128xf32, #tpu.memory_space<vmem>>, %arg18: memref<1x128xf32, #tpu.memory_space<vmem>>, %arg19: memref<1x16x128xf32, #tpu.memory_space<vmem>>, %arg20: memref<16x128xf32, #tpu.memory_space<vmem>>) attributes {dimension_semantics = [#tpu.dimension_semantics<parallel>, #tpu.dimension_semantics<arbitrary>], iteration_bounds = array<i64: 2, 4>, scalar_prefetch = 0 : i64, scratch_operands = 1 : i64, tpu.core_type = #tpu.core_type<tc>, window_params = [{transform_indices = @transform_0, window_bounds = array<i64: 1, 16, 128>}, {pipeline_mode = #tpu.pipeline_mode<synchronous>, transform_indices = @transform_1, window_bounds = array<i64: 16, 128>}, {pipeline_mode = #tpu.pipeline_mode<synchronous>, transform_indices = @transform_2, window_bounds = array<i64: 16, 16>}, {pipeline_mode = #tpu.pipeline_mode<synchronous>, transform_indices = @transform_3, window_bounds = array<i64: 1, 128>}, {pipeline_mode = #tpu.pipeline_mode<synchronous>, transform_indices = @transform_4, window_bounds = array<i64: 1, 128>}, {pipeline_mode = #tpu.pipeline_mode<synchronous>, transform_indices = @transform_5, window_bounds = array<i64: 128, 384>}, {pipeline_mode = #tpu.pipeline_mode<synchronous>, transform_indices = @transform_6, window_bounds = array<i64: 1, 384>}, {pipeline_mode = #tpu.pipeline_mode<synchronous>, transform_indices = @transform_7, window_bounds = array<i64: 128, 128>}, {pipeline_mode = #tpu.pipeline_mode<synchronous>, transform_indices = @transform_8, window_bounds = array<i64: 1, 128>}, {pipeline_mode = #tpu.pipeline_mode<synchronous>, transform_indices = @transform_9, window_bounds = array<i64: 1, 128>}, {pipeline_mode = #tpu.pipeline_mode<synchronous>, transform_indices = @transform_10, window_bounds = array<i64: 1, 128>}, {pipeline_mode = #tpu.pipeline_mode<synchronous>, transform_indices = @transform_11, window_bounds = array<i64: 128, 512>}, {pipeline_mode = #tpu.pipeline_mode<synchronous>, transform_indices = @transform_12, window_bounds = array<i64: 1, 512>}, {pipeline_mode = #tpu.pipeline_mode<synchronous>, transform_indices = @transform_13, window_bounds = array<i64: 512, 128>}, {pipeline_mode = #tpu.pipeline_mode<synchronous>, transform_indices = @transform_14, window_bounds = array<i64: 1, 128>}, {pipeline_mode = #tpu.pipeline_mode<synchronous>, transform_indices = @transform_15, window_bounds = array<i64: 1, 128>}, {pipeline_mode = #tpu.pipeline_mode<synchronous>, transform_indices = @transform_16, window_bounds = array<i64: 1, 128>}, {transform_indices = @transform_17, window_bounds = array<i64: 1, 16, 128>}]} {
    %c0_i32 = arith.constant 0 : i32
    %0 = arith.cmpi eq, %arg1, %c0_i32 : i32
    %1 = arith.extui %0 : i1 to i32
    %c0_i32_0 = arith.constant 0 : i32
    %2 = arith.cmpi ne, %1, %c0_i32_0 : i32
    scf.if %2 {
      %c0_64 = arith.constant 0 : index
      %c0_65 = arith.constant 0 : index
      %c0_66 = arith.constant 0 : index
      %182 = vector.load %arg2[%c0_64, %c0_65, %c0_66] : memref<1x16x128xf32, #tpu.memory_space<vmem>>, vector<1x16x128xf32>
      %183 = vector.shape_cast %182 : vector<1x16x128xf32> to vector<16x128xf32>
      %c0_67 = arith.constant 0 : index
      %c0_68 = arith.constant 0 : index
      %184 = vector.load %arg20[%c0_67, %c0_68] : memref<16x128xf32, #tpu.memory_space<vmem>>, vector<16x128xf32>
      tpu.vector_store %arg20[%c0_67, %c0_68], %183 {strides = array<i32>} : memref<16x128xf32, #tpu.memory_space<vmem>>, vector<16x128xf32>,
    } else {
    }
    %c0 = arith.constant 0 : index
    %c0_1 = arith.constant 0 : index
    %3 = vector.load %arg20[%c0, %c0_1] : memref<16x128xf32, #tpu.memory_space<vmem>>, vector<16x128xf32>
    %c0_2 = arith.constant 0 : index
    %c0_3 = arith.constant 0 : index
    %4 = vector.load %arg3[%c0_2, %c0_3] : memref<16x128xf32, #tpu.memory_space<vmem>>, vector<16x128xf32>
    %5 = arith.addf %3, %4 : vector<16x128xf32>
    %c0_4 = arith.constant 0 : index
    %c0_5 = arith.constant 0 : index
    %6 = vector.load %arg5[%c0_4, %c0_5] : memref<1x128xf32, #tpu.memory_space<vmem>>, vector<1x128xf32>
    %c0_6 = arith.constant 0 : index
    %c0_7 = arith.constant 0 : index
    %7 = vector.load %arg6[%c0_6, %c0_7] : memref<1x128xf32, #tpu.memory_space<vmem>>, vector<1x128xf32>
    %cst = arith.constant dense<0.000000e+00> : vector<16xf32>
    %8 = vector.multi_reduction <add>, %5, %cst [1] : vector<16x128xf32> to vector<16xf32>
    %9 = vector.shape_cast %8 : vector<16xf32> to vector<16x1xf32>
    %cst_8 = arith.constant 1.280000e+02 : f32
    %10 = vector.broadcast %cst_8 : f32 to vector<16x1xf32>
    %11 = arith.divf %9, %10 : vector<16x1xf32>
    %12 = vector.broadcast %11 : vector<16x1xf32> to vector<16x128xf32>
    %13 = arith.subf %5, %12 : vector<16x128xf32>
    %14 = arith.mulf %13, %13 : vector<16x128xf32>
    %cst_9 = arith.constant dense<0.000000e+00> : vector<16xf32>
    %15 = vector.multi_reduction <add>, %14, %cst_9 [1] : vector<16x128xf32> to vector<16xf32>
    %16 = vector.shape_cast %15 : vector<16xf32> to vector<16x1xf32>
    %cst_10 = arith.constant 1.280000e+02 : f32
    %17 = vector.broadcast %cst_10 : f32 to vector<16x1xf32>
    %18 = arith.divf %16, %17 : vector<16x1xf32>
    %19 = vector.broadcast %11 : vector<16x1xf32> to vector<16x128xf32>
    %20 = arith.subf %5, %19 : vector<16x128xf32>
    %cst_11 = arith.constant 9.99999974E-6 : f32
    %21 = vector.broadcast %cst_11 : f32 to vector<16x1xf32>
    %22 = arith.addf %18, %21 : vector<16x1xf32>
    %23 = math.rsqrt %22 : vector<16x1xf32>
    %24 = vector.broadcast %23 : vector<16x1xf32> to vector<16x128xf32>
    %25 = arith.mulf %20, %24 : vector<16x128xf32>
    %26 = vector.broadcast %6 : vector<1x128xf32> to vector<16x128xf32>
    %27 = arith.mulf %25, %26 : vector<16x128xf32>
    %28 = vector.broadcast %7 : vector<1x128xf32> to vector<16x128xf32>
    %29 = arith.addf %27, %28 : vector<16x128xf32>
    %30 = arith.truncf %29 : vector<16x128xf32> to vector<16x128xbf16>
    %c0_12 = arith.constant 0 : index
    %c0_13 = arith.constant 0 : index
    %31 = vector.load %arg7[%c0_12, %c0_13] : memref<128x384xbf16, #tpu.memory_space<vmem>>, vector<128x384xbf16>
    %cst_14 = arith.constant dense<0.000000e+00> : vector<16x384xf32>
    %32 = tpu.matmul %30, %31, %cst_14 {dimension_numbers = #tpu.dot_dimension_numbers<[1], [0], [0], [1], [0, 0, 1, 1], [], []>} : vector<16x128xbf16>, vector<128x384xbf16>, vector<16x384xf32> -> vector<16x384xf32>
    %c0_15 = arith.constant 0 : index
    %c0_16 = arith.constant 0 : index
    %33 = vector.load %arg8[%c0_15, %c0_16] : memref<1x384xf32, #tpu.memory_space<vmem>>, vector<1x384xf32>
    %34 = vector.broadcast %33 : vector<1x384xf32> to vector<16x384xf32>
    %35 = arith.addf %32, %34 : vector<16x384xf32>
    %36 = vector.extract_strided_slice %35 {offsets = [0, 0], sizes = [16, 128], strides = [1, 1]} : vector<16x384xf32> to vector<16x128xf32>
    %cst_17 = arith.constant 0.176776692 : f32
    %37 = vector.broadcast %cst_17 : f32 to vector<16x128xf32>
    %38 = arith.mulf %36, %37 : vector<16x128xf32>
    %39 = vector.extract_strided_slice %35 {offsets = [0, 128], sizes = [16, 128], strides = [1, 1]} : vector<16x384xf32> to vector<16x128xf32>
    %40 = vector.extract_strided_slice %35 {offsets = [0, 256], sizes = [16, 128], strides = [1, 1]} : vector<16x384xf32> to vector<16x128xf32>
    %41 = vector.extract_strided_slice %38 {offsets = [0, 0], sizes = [16, 32], strides = [1, 1]} : vector<16x128xf32> to vector<16x32xf32>
    %42 = vector.extract_strided_slice %38 {offsets = [0, 32], sizes = [16, 32], strides = [1, 1]} : vector<16x128xf32> to vector<16x32xf32>
    %43 = vector.extract_strided_slice %38 {offsets = [0, 64], sizes = [16, 32], strides = [1, 1]} : vector<16x128xf32> to vector<16x32xf32>
    %44 = vector.extract_strided_slice %38 {offsets = [0, 96], sizes = [16, 32], strides = [1, 1]} : vector<16x128xf32> to vector<16x32xf32>
    %45 = vector.shape_cast %41 : vector<16x32xf32> to vector<1x16x32xf32>
    %46 = vector.shape_cast %42 : vector<16x32xf32> to vector<1x16x32xf32>
    %47 = vector.shape_cast %43 : vector<16x32xf32> to vector<1x16x32xf32>
    %48 = vector.shape_cast %44 : vector<16x32xf32> to vector<1x16x32xf32>
    %49 = tpu.concatenate %45, %46, %47, %48 in 0 : vector<1x16x32xf32>, vector<1x16x32xf32>, vector<1x16x32xf32>, vector<1x16x32xf32> -> vector<4x16x32xf32>
    %50 = arith.truncf %49 : vector<4x16x32xf32> to vector<4x16x32xbf16>
    %51 = vector.extract_strided_slice %39 {offsets = [0, 0], sizes = [16, 32], strides = [1, 1]} : vector<16x128xf32> to vector<16x32xf32>
    %52 = vector.extract_strided_slice %39 {offsets = [0, 32], sizes = [16, 32], strides = [1, 1]} : vector<16x128xf32> to vector<16x32xf32>
    %53 = vector.extract_strided_slice %39 {offsets = [0, 64], sizes = [16, 32], strides = [1, 1]} : vector<16x128xf32> to vector<16x32xf32>
    %54 = vector.extract_strided_slice %39 {offsets = [0, 96], sizes = [16, 32], strides = [1, 1]} : vector<16x128xf32> to vector<16x32xf32>
    %55 = vector.shape_cast %51 : vector<16x32xf32> to vector<1x16x32xf32>
    %56 = vector.shape_cast %52 : vector<16x32xf32> to vector<1x16x32xf32>
    %57 = vector.shape_cast %53 : vector<16x32xf32> to vector<1x16x32xf32>
    %58 = vector.shape_cast %54 : vector<16x32xf32> to vector<1x16x32xf32>
    %59 = tpu.concatenate %55, %56, %57, %58 in 0 : vector<1x16x32xf32>, vector<1x16x32xf32>, vector<1x16x32xf32>, vector<1x16x32xf32> -> vector<4x16x32xf32>
    %60 = arith.truncf %59 : vector<4x16x32xf32> to vector<4x16x32xbf16>
    %61 = vector.extract_strided_slice %40 {offsets = [0, 0], sizes = [16, 32], strides = [1, 1]} : vector<16x128xf32> to vector<16x32xf32>
    %62 = vector.extract_strided_slice %40 {offsets = [0, 32], sizes = [16, 32], strides = [1, 1]} : vector<16x128xf32> to vector<16x32xf32>
    %63 = vector.extract_strided_slice %40 {offsets = [0, 64], sizes = [16, 32], strides = [1, 1]} : vector<16x128xf32> to vector<16x32xf32>
    %64 = vector.extract_strided_slice %40 {offsets = [0, 96], sizes = [16, 32], strides = [1, 1]} : vector<16x128xf32> to vector<16x32xf32>
    %65 = vector.shape_cast %61 : vector<16x32xf32> to vector<1x16x32xf32>
    %66 = vector.shape_cast %62 : vector<16x32xf32> to vector<1x16x32xf32>
    %67 = vector.shape_cast %63 : vector<16x32xf32> to vector<1x16x32xf32>
    %68 = vector.shape_cast %64 : vector<16x32xf32> to vector<1x16x32xf32>
    %69 = tpu.concatenate %65, %66, %67, %68 in 0 : vector<1x16x32xf32>, vector<1x16x32xf32>, vector<1x16x32xf32>, vector<1x16x32xf32> -> vector<4x16x32xf32>
    %70 = arith.truncf %69 : vector<4x16x32xf32> to vector<4x16x32xbf16>
    "tpu.trace_start"() <{level = 10 : i32, message = "hqd,hkd->hqk"}> : () -> ()
    %cst_18 = arith.constant dense<0.000000e+00> : vector<4x16x16xf32>
    %71 = tpu.matmul %50, %60, %cst_18 {dimension_numbers = #tpu.dot_dimension_numbers<[2], [2], [1], [1], [0, 0, 0, 1, 1, 1], [0], [0]>} : vector<4x16x32xbf16>, vector<4x16x32xbf16>, vector<4x16x16xf32> -> vector<4x16x16xf32>
    "tpu.trace_stop"() : () -> ()
    %c0_19 = arith.constant 0 : index
    %c0_20 = arith.constant 0 : index
    %72 = vector.load %arg4[%c0_19, %c0_20] : memref<16x16xf32, #tpu.memory_space<vmem>>, vector<16x16xf32>
    %73 = vector.shape_cast %72 : vector<16x16xf32> to vector<1x16x16xf32>
    %74 = vector.broadcast %73 : vector<1x16x16xf32> to vector<4x16x16xf32>
    %75 = arith.addf %71, %74 : vector<4x16x16xf32>
    %cst_21 = arith.constant dense<0xFF800000> : vector<4x16xf32>
    %76 = vector.multi_reduction <maximumf>, %75, %cst_21 [2] : vector<4x16x16xf32> to vector<4x16xf32>
    %77 = vector.shape_cast %76 : vector<4x16xf32> to vector<4x16x1xf32>
    %78 = vector.broadcast %77 : vector<4x16x1xf32> to vector<4x16x16xf32>
    %79 = arith.subf %75, %78 : vector<4x16x16xf32>
    %80 = math.exp %79 : vector<4x16x16xf32>
    %cst_22 = arith.constant dense<0.000000e+00> : vector<4x16xf32>
    %81 = vector.multi_reduction <add>, %80, %cst_22 [2] : vector<4x16x16xf32> to vector<4x16xf32>
    %82 = vector.shape_cast %81 : vector<4x16xf32> to vector<4x16x1xf32>
    %83 = tpu.reciprocal %82 {approx = true} : vector<4x16x1xf32> -> vector<4x16x1xf32>
    %84 = vector.broadcast %83 : vector<4x16x1xf32> to vector<4x16x16xf32>
    %85 = arith.mulf %80, %84 : vector<4x16x16xf32>
    %86 = arith.truncf %85 : vector<4x16x16xf32> to vector<4x16x16xbf16>
    "tpu.trace_start"() <{level = 10 : i32, message = "hqk,hkd->hqd"}> : () -> ()
    %cst_23 = arith.constant dense<0.000000e+00> : vector<4x16x32xf32>
    %87 = tpu.matmul %86, %70, %cst_23 {dimension_numbers = #tpu.dot_dimension_numbers<[2], [1], [1], [2], [0, 0, 0, 1, 1, 2], [0], [0]>} : vector<4x16x16xbf16>, vector<4x16x32xbf16>, vector<4x16x32xf32> -> vector<4x16x32xf32>
    "tpu.trace_stop"() : () -> ()
    %88 = vector.extract_strided_slice %87 {offsets = [0, 0, 0], sizes = [1, 16, 32], strides = [1, 1, 1]} : vector<4x16x32xf32> to vector<1x16x32xf32>
    %89 = vector.shape_cast %88 : vector<1x16x32xf32> to vector<16x32xf32>
    %90 = vector.extract_strided_slice %87 {offsets = [1, 0, 0], sizes = [1, 16, 32], strides = [1, 1, 1]} : vector<4x16x32xf32> to vector<1x16x32xf32>
    %91 = vector.shape_cast %90 : vector<1x16x32xf32> to vector<16x32xf32>
    %92 = vector.extract_strided_slice %87 {offsets = [2, 0, 0], sizes = [1, 16, 32], strides = [1, 1, 1]} : vector<4x16x32xf32> to vector<1x16x32xf32>
    %93 = vector.shape_cast %92 : vector<1x16x32xf32> to vector<16x32xf32>
    %94 = vector.extract_strided_slice %87 {offsets = [3, 0, 0], sizes = [1, 16, 32], strides = [1, 1, 1]} : vector<4x16x32xf32> to vector<1x16x32xf32>
    %95 = vector.shape_cast %94 : vector<1x16x32xf32> to vector<16x32xf32>
    %96 = tpu.concatenate %89, %91, %93, %95 in 1 : vector<16x32xf32>, vector<16x32xf32>, vector<16x32xf32>, vector<16x32xf32> -> vector<16x128xf32>
    %97 = arith.truncf %96 : vector<16x128xf32> to vector<16x128xbf16>
    %c0_24 = arith.constant 0 : index
    %c0_25 = arith.constant 0 : index
    %98 = vector.load %arg9[%c0_24, %c0_25] : memref<128x128xbf16, #tpu.memory_space<vmem>>, vector<128x128xbf16>
    %cst_26 = arith.constant dense<0.000000e+00> : vector<16x128xf32>
    %99 = tpu.matmul %97, %98, %cst_26 {dimension_numbers = #tpu.dot_dimension_numbers<[1], [0], [0], [1], [0, 0, 1, 1], [], []>} : vector<16x128xbf16>, vector<128x128xbf16>, vector<16x128xf32> -> vector<16x128xf32>
    %c0_27 = arith.constant 0 : index
    %c0_28 = arith.constant 0 : index
    %100 = vector.load %arg10[%c0_27, %c0_28] : memref<1x128xf32, #tpu.memory_space<vmem>>, vector<1x128xf32>
    %101 = vector.broadcast %100 : vector<1x128xf32> to vector<16x128xf32>
    %102 = arith.addf %99, %101 : vector<16x128xf32>
    %103 = arith.addf %5, %102 : vector<16x128xf32>
    %c0_29 = arith.constant 0 : index
    %c0_30 = arith.constant 0 : index
    %104 = vector.load %arg11[%c0_29, %c0_30] : memref<1x128xf32, #tpu.memory_space<vmem>>, vector<1x128xf32>
    %c0_31 = arith.constant 0 : index
    %c0_32 = arith.constant 0 : index
    %105 = vector.load %arg12[%c0_31, %c0_32] : memref<1x128xf32, #tpu.memory_space<vmem>>, vector<1x128xf32>
    %cst_33 = arith.constant dense<0.000000e+00> : vector<16xf32>
    %106 = vector.multi_reduction <add>, %103, %cst_33 [1] : vector<16x128xf32> to vector<16xf32>
    %107 = vector.shape_cast %106 : vector<16xf32> to vector<16x1xf32>
    %cst_34 = arith.constant 1.280000e+02 : f32
    %108 = vector.broadcast %cst_34 : f32 to vector<16x1xf32>
    %109 = arith.divf %107, %108 : vector<16x1xf32>
    %110 = vector.broadcast %109 : vector<16x1xf32> to vector<16x128xf32>
    %111 = arith.subf %103, %110 : vector<16x128xf32>
    %112 = arith.mulf %111, %111 : vector<16x128xf32>
    %cst_35 = arith.constant dense<0.000000e+00> : vector<16xf32>
    %113 = vector.multi_reduction <add>, %112, %cst_35 [1] : vector<16x128xf32> to vector<16xf32>
    %114 = vector.shape_cast %113 : vector<16xf32> to vector<16x1xf32>
    %cst_36 = arith.constant 1.280000e+02 : f32
    %115 = vector.broadcast %cst_36 : f32 to vector<16x1xf32>
    %116 = arith.divf %114, %115 : vector<16x1xf32>
    %117 = vector.broadcast %109 : vector<16x1xf32> to vector<16x128xf32>
    %118 = arith.subf %103, %117 : vector<16x128xf32>
    %cst_37 = arith.constant 9.99999974E-6 : f32
    %119 = vector.broadcast %cst_37 : f32 to vector<16x1xf32>
    %120 = arith.addf %116, %119 : vector<16x1xf32>
    %121 = math.rsqrt %120 : vector<16x1xf32>
    %122 = vector.broadcast %121 : vector<16x1xf32> to vector<16x128xf32>
    %123 = arith.mulf %118, %122 : vector<16x128xf32>
    %124 = vector.broadcast %104 : vector<1x128xf32> to vector<16x128xf32>
    %125 = arith.mulf %123, %124 : vector<16x128xf32>
    %126 = vector.broadcast %105 : vector<1x128xf32> to vector<16x128xf32>
    %127 = arith.addf %125, %126 : vector<16x128xf32>
    %128 = arith.truncf %127 : vector<16x128xf32> to vector<16x128xbf16>
    %c0_38 = arith.constant 0 : index
    %c0_39 = arith.constant 0 : index
    %129 = vector.load %arg13[%c0_38, %c0_39] : memref<128x512xbf16, #tpu.memory_space<vmem>>, vector<128x512xbf16>
    %cst_40 = arith.constant dense<0.000000e+00> : vector<16x512xf32>
    %130 = tpu.matmul %128, %129, %cst_40 {dimension_numbers = #tpu.dot_dimension_numbers<[1], [0], [0], [1], [0, 0, 1, 1], [], []>} : vector<16x128xbf16>, vector<128x512xbf16>, vector<16x512xf32> -> vector<16x512xf32>
    %c0_41 = arith.constant 0 : index
    %c0_42 = arith.constant 0 : index
    %131 = vector.load %arg14[%c0_41, %c0_42] : memref<1x512xf32, #tpu.memory_space<vmem>>, vector<1x512xf32>
    %132 = vector.broadcast %131 : vector<1x512xf32> to vector<16x512xf32>
    %133 = arith.addf %130, %132 : vector<16x512xf32>
    %cst_43 = arith.constant 5.000000e-01 : f32
    %134 = vector.broadcast %cst_43 : f32 to vector<16x512xf32>
    %135 = arith.mulf %134, %133 : vector<16x512xf32>
    %cst_44 = arith.constant 4.471500e-02 : f32
    %136 = vector.broadcast %cst_44 : f32 to vector<16x512xf32>
    %137 = arith.mulf %136, %133 : vector<16x512xf32>
    %138 = arith.mulf %137, %133 : vector<16x512xf32>
    %139 = arith.mulf %138, %133 : vector<16x512xf32>
    %140 = arith.addf %133, %139 : vector<16x512xf32>
    %cst_45 = arith.constant 0.797884583 : f32
    %141 = vector.broadcast %cst_45 : f32 to vector<16x512xf32>
    %142 = arith.mulf %141, %140 : vector<16x512xf32>
    %143 = math.tanh %142 : vector<16x512xf32>
    %cst_46 = arith.constant 1.000000e+00 : f32
    %144 = vector.broadcast %cst_46 : f32 to vector<16x512xf32>
    %145 = arith.addf %144, %143 : vector<16x512xf32>
    %146 = arith.mulf %135, %145 : vector<16x512xf32>
    %147 = arith.truncf %146 : vector<16x512xf32> to vector<16x512xbf16>
    %c0_47 = arith.constant 0 : index
    %c0_48 = arith.constant 0 : index
    %148 = vector.load %arg15[%c0_47, %c0_48] : memref<512x128xbf16, #tpu.memory_space<vmem>>, vector<512x128xbf16>
    %cst_49 = arith.constant dense<0.000000e+00> : vector<16x128xf32>
    %149 = tpu.matmul %147, %148, %cst_49 {dimension_numbers = #tpu.dot_dimension_numbers<[1], [0], [0], [1], [0, 0, 1, 1], [], []>} : vector<16x512xbf16>, vector<512x128xbf16>, vector<16x128xf32> -> vector<16x128xf32>
    %c0_50 = arith.constant 0 : index
    %c0_51 = arith.constant 0 : index
    %150 = vector.load %arg16[%c0_50, %c0_51] : memref<1x128xf32, #tpu.memory_space<vmem>>, vector<1x128xf32>
    %151 = vector.broadcast %150 : vector<1x128xf32> to vector<16x128xf32>
    %152 = arith.addf %149, %151 : vector<16x128xf32>
    %153 = arith.addf %103, %152 : vector<16x128xf32>
    %c0_52 = arith.constant 0 : index
    %c0_53 = arith.constant 0 : index
    %154 = vector.load %arg17[%c0_52, %c0_53] : memref<1x128xf32, #tpu.memory_space<vmem>>, vector<1x128xf32>
    %c0_54 = arith.constant 0 : index
    %c0_55 = arith.constant 0 : index
    %155 = vector.load %arg18[%c0_54, %c0_55] : memref<1x128xf32, #tpu.memory_space<vmem>>, vector<1x128xf32>
    %cst_56 = arith.constant dense<0.000000e+00> : vector<16xf32>
    %156 = vector.multi_reduction <add>, %153, %cst_56 [1] : vector<16x128xf32> to vector<16xf32>
    %157 = vector.shape_cast %156 : vector<16xf32> to vector<16x1xf32>
    %cst_57 = arith.constant 1.280000e+02 : f32
    %158 = vector.broadcast %cst_57 : f32 to vector<16x1xf32>
    %159 = arith.divf %157, %158 : vector<16x1xf32>
    %160 = vector.broadcast %159 : vector<16x1xf32> to vector<16x128xf32>
    %161 = arith.subf %153, %160 : vector<16x128xf32>
    %162 = arith.mulf %161, %161 : vector<16x128xf32>
    %cst_58 = arith.constant dense<0.000000e+00> : vector<16xf32>
    %163 = vector.multi_reduction <add>, %162, %cst_58 [1] : vector<16x128xf32> to vector<16xf32>
    %164 = vector.shape_cast %163 : vector<16xf32> to vector<16x1xf32>
    %cst_59 = arith.constant 1.280000e+02 : f32
    %165 = vector.broadcast %cst_59 : f32 to vector<16x1xf32>
    %166 = arith.divf %164, %165 : vector<16x1xf32>
    %167 = vector.broadcast %159 : vector<16x1xf32> to vector<16x128xf32>
    %168 = arith.subf %153, %167 : vector<16x128xf32>
    %cst_60 = arith.constant 9.99999974E-6 : f32
    %169 = vector.broadcast %cst_60 : f32 to vector<16x1xf32>
    %170 = arith.addf %166, %169 : vector<16x1xf32>
    %171 = math.rsqrt %170 : vector<16x1xf32>
    %172 = vector.broadcast %171 : vector<16x1xf32> to vector<16x128xf32>
    %173 = arith.mulf %168, %172 : vector<16x128xf32>
    %174 = vector.broadcast %154 : vector<1x128xf32> to vector<16x128xf32>
    %175 = arith.mulf %173, %174 : vector<16x128xf32>
    %176 = vector.broadcast %155 : vector<1x128xf32> to vector<16x128xf32>
    %177 = arith.addf %175, %176 : vector<16x128xf32>
    %c0_61 = arith.constant 0 : index
    %c0_62 = arith.constant 0 : index
    %178 = vector.load %arg20[%c0_61, %c0_62] : memref<16x128xf32, #tpu.memory_space<vmem>>, vector<16x128xf32>
    tpu.vector_store %arg20[%c0_61, %c0_62], %177 {strides = array<i32>} : memref<16x128xf32, #tpu.memory_space<vmem>>, vector<16x128xf32>,
    %c3_i32 = arith.constant 3 : i32
    %179 = arith.cmpi eq, %arg1, %c3_i32 : i32
    %180 = arith.extui %179 : i1 to i32
    %c0_i32_63 = arith.constant 0 : i32
    %181 = arith.cmpi ne, %180, %c0_i32_63 : i32
    scf.if %181 {
      %c0_64 = arith.constant 0 : index
      %c0_65 = arith.constant 0 : index
      %c0_66 = arith.constant 0 : index
      %182 = vector.load %arg19[%c0_64, %c0_65, %c0_66] : memref<1x16x128xf32, #tpu.memory_space<vmem>>, vector<1x16x128xf32>
      %183 = vector.shape_cast %182 : vector<1x16x128xf32> to vector<16x128xf32>
      %184 = vector.shape_cast %177 : vector<16x128xf32> to vector<1x16x128xf32>
      tpu.vector_store %arg19[%c0_64, %c0_65, %c0_66], %184 {strides = array<i32>} : memref<1x16x128xf32, #tpu.memory_space<vmem>>, vector<1x16x128xf32>,
    } else {
    }
    return
  }
  func.func @transform_0(%arg0: i32, %arg1: i32) -> (i32, i32, i32) {
    %c0_i32 = arith.constant 0 : i32
    %c0_i32_0 = arith.constant 0 : i32
    %c0_i32_1 = arith.constant 0 : i32
    return %arg0, %c0_i32, %c0_i32_0 : i32, i32, i32
  }
  func.func @transform_1(%arg0: i32, %arg1: i32) -> (i32, i32) {
    %c0_i32 = arith.constant 0 : i32
    %c0_i32_0 = arith.constant 0 : i32
    %c0_i32_1 = arith.constant 0 : i32
    return %c0_i32, %c0_i32_0 : i32, i32
  }
  func.func @transform_2(%arg0: i32, %arg1: i32) -> (i32, i32) {
    %c0_i32 = arith.constant 0 : i32
    %c0_i32_0 = arith.constant 0 : i32
    %c0_i32_1 = arith.constant 0 : i32
    return %c0_i32, %c0_i32_0 : i32, i32
  }
  func.func @transform_3(%arg0: i32, %arg1: i32) -> (i32, i32) {
    %c0_i32 = arith.constant 0 : i32
    %c0_i32_0 = arith.constant 0 : i32
    %c0_i32_1 = arith.constant 0 : i32
    return %c0_i32, %c0_i32_0 : i32, i32
  }
  func.func @transform_4(%arg0: i32, %arg1: i32) -> (i32, i32) {
    %c0_i32 = arith.constant 0 : i32
    %c0_i32_0 = arith.constant 0 : i32
    %c0_i32_1 = arith.constant 0 : i32
    return %c0_i32, %c0_i32_0 : i32, i32
  }
  func.func @transform_5(%arg0: i32, %arg1: i32) -> (i32, i32) {
    %c0_i32 = arith.constant 0 : i32
    %c0_i32_0 = arith.constant 0 : i32
    %c0_i32_1 = arith.constant 0 : i32
    return %c0_i32, %c0_i32_0 : i32, i32
  }
  func.func @transform_6(%arg0: i32, %arg1: i32) -> (i32, i32) {
    %c0_i32 = arith.constant 0 : i32
    %c0_i32_0 = arith.constant 0 : i32
    %c0_i32_1 = arith.constant 0 : i32
    return %c0_i32, %c0_i32_0 : i32, i32
  }
  func.func @transform_7(%arg0: i32, %arg1: i32) -> (i32, i32) {
    %c0_i32 = arith.constant 0 : i32
    %c0_i32_0 = arith.constant 0 : i32
    %c0_i32_1 = arith.constant 0 : i32
    return %c0_i32, %c0_i32_0 : i32, i32
  }
  func.func @transform_8(%arg0: i32, %arg1: i32) -> (i32, i32) {
    %c0_i32 = arith.constant 0 : i32
    %c0_i32_0 = arith.constant 0 : i32
    %c0_i32_1 = arith.constant 0 : i32
    return %c0_i32, %c0_i32_0 : i32, i32
  }
  func.func @transform_9(%arg0: i32, %arg1: i32) -> (i32, i32) {
    %c0_i32 = arith.constant 0 : i32
    %c0_i32_0 = arith.constant 0 : i32
    %c0_i32_1 = arith.constant 0 : i32
    return %c0_i32, %c0_i32_0 : i32, i32
  }
  func.func @transform_10(%arg0: i32, %arg1: i32) -> (i32, i32) {
    %c0_i32 = arith.constant 0 : i32
    %c0_i32_0 = arith.constant 0 : i32
    %c0_i32_1 = arith.constant 0 : i32
    return %c0_i32, %c0_i32_0 : i32, i32
  }
  func.func @transform_11(%arg0: i32, %arg1: i32) -> (i32, i32) {
    %c0_i32 = arith.constant 0 : i32
    %c0_i32_0 = arith.constant 0 : i32
    %c0_i32_1 = arith.constant 0 : i32
    return %c0_i32, %c0_i32_0 : i32, i32
  }
  func.func @transform_12(%arg0: i32, %arg1: i32) -> (i32, i32) {
    %c0_i32 = arith.constant 0 : i32
    %c0_i32_0 = arith.constant 0 : i32
    %c0_i32_1 = arith.constant 0 : i32
    return %c0_i32, %c0_i32_0 : i32, i32
  }
  func.func @transform_13(%arg0: i32, %arg1: i32) -> (i32, i32) {
    %c0_i32 = arith.constant 0 : i32
    %c0_i32_0 = arith.constant 0 : i32
    %c0_i32_1 = arith.constant 0 : i32
    return %c0_i32, %c0_i32_0 : i32, i32
  }
  func.func @transform_14(%arg0: i32, %arg1: i32) -> (i32, i32) {
    %c0_i32 = arith.constant 0 : i32
    %c0_i32_0 = arith.constant 0 : i32
    %c0_i32_1 = arith.constant 0 : i32
    return %c0_i32, %c0_i32_0 : i32, i32
  }
  func.func @transform_15(%arg0: i32, %arg1: i32) -> (i32, i32) {
    %c0_i32 = arith.constant 0 : i32
    %c0_i32_0 = arith.constant 0 : i32
    %c0_i32_1 = arith.constant 0 : i32
    return %c0_i32, %c0_i32_0 : i32, i32
  }
  func.func @transform_16(%arg0: i32, %arg1: i32) -> (i32, i32) {
    %c0_i32 = arith.constant 0 : i32
    %c0_i32_0 = arith.constant 0 : i32
    %c0_i32_1 = arith.constant 0 : i32
    return %c0_i32, %c0_i32_0 : i32, i32
  }
  func.func @transform_17(%arg0: i32, %arg1: i32) -> (i32, i32, i32) {
    %c0_i32 = arith.constant 0 : i32
    %c0_i32_0 = arith.constant 0 : i32
    %c0_i32_1 = arith.constant 0 : i32
    return %arg0, %c0_i32, %c0_i32_0 : i32, i32, i32
  }
}

</mosaic_0001>

<bundles_post_ra>
// kernel: tpu_custom_call.1
= control target key start
LH: loop header
LB: loop body
LE: loop exit
PB: predicated region body
PF: predicated region fallthrough
CT: control target
= control target key end

     0   :  { %s4273_s0 = inlined_call_operand.hbm [shape: f32[2,16,128], index: 0, kind: input, shape index: {}]   ;;  %s4274_s1 = inlined_call_operand.hbm [shape: f32[16,128], index: 1, kind: input, shape index: {}]   ;;  %s4275_s2 = inlined_call_operand.hbm [shape: f32[16,16], index: 2, kind: input, shape index: {}]   ;;  %s4276_s3 = inlined_call_operand.hbm [shape: f32[1,128], index: 3, kind: input, shape index: {}]   ;;  %s4277_s4 = inlined_call_operand.hbm [shape: f32[1,128], index: 4, kind: input, shape index: {}]   ;;  %s4278_s5 = inlined_call_operand.hbm [shape: bf16[128,384], index: 5, kind: input, shape index: {}]   ;;  %s4279_s6 = inlined_call_operand.vmem [shape: f32[1,384], index: 6, kind: input, shape index: {}]   ;;  %s4280_s7 = inlined_call_operand.hbm [shape: bf16[128,128], index: 7, kind: input, shape index: {}]   ;;  %s4281_s8 = inlined_call_operand.hbm [shape: f32[1,128], index: 8, kind: input, shape index: {}]   ;;  %s4282_s9 = inlined_call_operand.vmem [shape: f32[1,128], index: 9, kind: input, shape index: {}]   ;;  %s4283_s10 = inlined_call_operand.vmem [shape: f32[1,128], index: 10, kind: input, shape index: {}]   ;;  %s4284_s11 = inlined_call_operand.hbm [shape: bf16[128,512], index: 11, kind: input, shape index: {}]   ;;  %s4285_s12 = inlined_call_operand.vmem [shape: f32[1,512], index: 12, kind: input, shape index: {}]   ;;  %s4286_s13 = inlined_call_operand.hbm [shape: bf16[512,128], index: 13, kind: input, shape index: {}]   ;;  %s4287_s14 = inlined_call_operand.vmem [shape: f32[1,128], index: 14, kind: input, shape index: {}]   ;;  %s4288_s15 = inlined_call_operand.vmem [shape: f32[1,128], index: 15, kind: input, shape index: {}]   ;;  %s4289_s16 = inlined_call_operand.vmem [shape: f32[1,128], index: 16, kind: input, shape index: {}]   ;;  %s4290_s17 = inlined_call_operand.hbm [shape: f32[2,16,128], index: 17, kind: output, shape index: {}]  }
   0x1   :  { %4297 = sst [smem:[#allocation30_spill]] %s4273_s0 }
   0x2   :  { %4298 = sst [smem:[#allocation31_spill]] %s4274_s1 }
   0x3   :  { %4299 = sst [smem:[#allocation32_spill]] %s4275_s2 }
   0x4   :  { %4300 = sst [smem:[#allocation33_spill]] %s4276_s3 }
   0x5   :  { %4301 = sst [smem:[#allocation34_spill]] %s4277_s4 }
   0x6   :  { %4302 = sst [smem:[#allocation35_spill]] %s4278_s5 }
   0x7   :  { %4303 = sst [smem:[#allocation36_spill]] %s4279_s6 }
   0x8   :  { %4304 = sst [smem:[#allocation37_spill]] %s4280_s7 }
   0x9   :  { %4305 = sst [smem:[#allocation38_spill]] %s4281_s8 }
   0xa   :  { %4306 = sst [smem:[#allocation39_spill]] %s4282_s9 }
   0xb   :  { %4307 = sst [smem:[#allocation40_spill]] %s4283_s10 }
   0xc   :  { %4308 = sst [smem:[#allocation41_spill]] %s4284_s11 }
   0xd   :  { %4309 = sst [smem:[#allocation42_spill]] %s4285_s12 }
   0xe   :  { %4310 = sst [smem:[#allocation43_spill]] %s4287_s14 }
   0xf   :  { %4311 = sst [smem:[#allocation44_spill]] %s4288_s15 }
  0x10   :  { %4312 = sst [smem:[#allocation45_spill]] %s4289_s16 }
  0x11   :  { %4313 = sst [smem:[#allocation46_spill]] %s4290_s17 }
  0x12   :  { %22 = vsyncpa [#allocation4], 0 }
  0x13   :  { %24 = vsyncpa [#allocation4 + $0x1], 0 }
  0x14   :  { %25 = vsyncpa [#allocation7], 0 }
  0x15   :  { %26 = vsyncpa [#allocation10], 0 }
  0x16   :  { %27 = vsyncpa [#allocation13], 0 }
  0x17   :  { %28 = vsyncpa [#allocation16], 0 }
  0x18   :  { %29 = vsyncpa [#allocation19], 0 }
  0x19   :  { %30 = vsyncpa [#allocation5], 0 }
  0x1a   :  { %32 = vsyncpa [#allocation5 + $0x1], 0  ;;  %s3866_s24 = smov 0   ;;  %s3868_s25 = smov 0  }
  0x1b   :  { %s3870_s26 = smov 0   ;;  %s3872_s27 = smov 0  }
  0x1c   :  { %s3874_s28 = smov 0   ;;  %s3876_s29 = smov 0  }
  0x1d   :  { %s3878_s0 = smov 0   ;;  %s3880_s30 = smov 0  }
  0x1e LB: > { %4314 = sst [smem:[#allocation28_spill]] %s3735_s27  ;;  %s4292_s18 = sadd.s32 4294967295, %s3751_s30   ;;  %s3751_s30 = sphi %s3880_s30, %s38_s30   ;;  %s3747_s0 = sphi %s3878_s0, %s4352_s0   ;;  %s3743_s29 = sphi %s3876_s29, %s4351_s29   ;;  %s3739_s28 = sphi %s3874_s28, %s4350_s28   ;;  %s3735_s27 = sphi %s3872_s27, %s4349_s27   ;;  %s3731_s26 = sphi %s3870_s26, %s4348_s26   ;;  %s3727_s25 = sphi %s3868_s25, %s4347_s25   ;;  %s3723_s24 = sphi %s3866_s24, %s4346_s24  }
  0x1f   : > { %4315 = sst [smem:[#allocation29_spill]] %s3739_s28  ;;  %p2497_p0 = scmp.ge.s32.totalorder %s3751_s30, 1 }
  0x20   : > { %p3910_p1 = scmp.eq.s32.totalorder %s4292_s18, 0  ;;  %p443_p2 = scmp.lt.s32.totalorder %s3751_s30, 9 }
  0x21   : > { %s4317_s21 = sld [smem:[#allocation31_spill]]  ;;  %s3753_s17 = smov [#allocation6]  }
  0x22   : > { %p3918_p3 = pnand %p2497_p0, %p443_p2  ;;  %s456_s28 = sshll.u32 %s3753_s17, 4  ;;  %s457_s28 = int_to_ptr.vmem [resolvable:$true] %s456_s28 }
  0x23   : > { %s4320_s3 = sld [smem:[#allocation33_spill]]  ;;  %s4293_s20 = smov 128  }
  0x24   : > { %p3060_p4 = pneg %p3918_p3  ;;  %s3756_s17 = smov [#allocation9]  }
  0x25   : > { %s485_s14 = sshll.u32 %s3756_s17, 4  ;;  %s4321_s5 = sld [smem:[#allocation35_spill]]  ;;  %s486_s14 = int_to_ptr.vmem [resolvable:$true] %s485_s14 }
  0x26   : > { %p3926_p5 = pnand %p3060_p4, %p3910_p1  ;;  %s3757_s15 = smov [#allocation12]  }
  0x27   : > { %s454_s22 = sshll.u32 %s4317_s21, 4  ;;  %s4295_s21 = smov 8   ;;  %s455_s22 = int_to_ptr.hbm [resolvable:$true] %s454_s22 }
  0x28   : > { %3063 = dma.hbm_to_vmem [thread:$0]  (!%p3926_p5), %s455_s22, 256, %s457_s28, [#allocation7], %s4293_s20, %s4293_s20, %s4295_s21  }
  0x29   : > { %s483_s1 = sshll.u32 %s4320_s3, 4  ;;  %s508_s16 = sshll.u32 %s3757_s15, 4  ;;  %s484_s1 = int_to_ptr.hbm [resolvable:$true] %s483_s1  ;;  %s509_s16 = int_to_ptr.vmem [resolvable:$true] %s508_s16 }
  0x2a   : > { %3069 = dma.hbm_to_vmem [thread:$0]  (!%p3926_p5), %s484_s1, 16, %s486_s14, [#allocation10]  }
  0x2b   : > { %s506_s9 = sshll.u32 %s4321_s5, 4  ;;  %s4322_s8 = sld [smem:[#allocation38_spill]]  ;;  %s507_s9 = int_to_ptr.hbm [resolvable:$true] %s506_s9 }
  0x2c   : > { %s3758_s28 = smov 192   ;;  %s3759_s22 = smov 12  }
  0x2d   : > { %3075 = dma.hbm_to_vmem [thread:$0]  (!%p3926_p5), %s507_s9, 3072, %s509_s16, [#allocation13], %s3758_s28, %s3758_s28, %s3759_s22  }
  0x2e   : > { %s3760_s10 = smov [#allocation15]   ;;  %s4323_s2 = sld [smem:[#allocation32_spill]] }
  0x2f   : > { %s540_s12 = sshll.u32 %s3760_s10, 4  ;;  %s4324_s4 = sld [smem:[#allocation34_spill]]  ;;  %s541_s12 = int_to_ptr.vmem [resolvable:$true] %s540_s12 }
  0x30   : > { %s3761_s15 = smov [#allocation8]   ;;  %s4325_s9 = smov 8  }
  0x31   : > { %s538_s27 = sshll.u32 %s4322_s8, 4  ;;  %s470_s21 = sshll.u32 %s3761_s15, 4  ;;  %s539_s27 = int_to_ptr.hbm [resolvable:$true] %s538_s27  ;;  %s471_s21 = int_to_ptr.vmem [resolvable:$true] %s470_s21 }
  0x32   : > { %3081 = dma.hbm_to_vmem [thread:$0]  (!%p3926_p5), %s539_s27, 16, %s541_s12, [#allocation16]  }
  0x33   : > { %s4326_s16 = smov 128   ;;  %s3762_s20 = smov [#allocation11]  }
  0x34   : > { %s468_s14 = sshll.u32 %s4323_s2, 4  ;;  %s497_s28 = sshll.u32 %s3762_s20, 4  ;;  %s469_s14 = int_to_ptr.hbm [resolvable:$true] %s468_s14  ;;  %s498_s28 = int_to_ptr.vmem [resolvable:$true] %s497_s28 }
  0x35   : > { %s495_s6 = sshll.u32 %s4324_s4, 4  ;;  %s4327_s7 = sld [smem:[#allocation37_spill]]  ;;  %s496_s6 = int_to_ptr.hbm [resolvable:$true] %s495_s6 }
  0x36   : > { %3066 = dma.hbm_to_vmem [thread:$0]  (!%p3926_p5), %s469_s14, 256, %s471_s21, [#allocation7], %s4326_s16, %s4326_s16, %s4325_s9  }
  0x37   : > { %3072 = dma.hbm_to_vmem [thread:$0]  (!%p3926_p5), %s496_s6, 16, %s498_s28, [#allocation10]  }
  0x38   : > { %s3763_s12 = smov [#allocation14]   ;;  %s4328_s11 = sld [smem:[#allocation41_spill]] }
  0x39   : > { %s525_s17 = sshll.u32 %s3763_s12, 4  ;;  %s3764_s21 = smov 64   ;;  %s526_s17 = int_to_ptr.vmem [resolvable:$true] %s525_s17 }
  0x3a   : > { %s3765_s14 = smov 4   ;;  %s3766_s20 = smov [#allocation17]  }
  0x3b   : > { %s523_s27 = sshll.u32 %s4327_s7, 4  ;;  %s557_s22 = sshll.u32 %s3766_s20, 4  ;;  %s524_s27 = int_to_ptr.hbm [resolvable:$true] %s523_s27  ;;  %s558_s22 = int_to_ptr.vmem [resolvable:$true] %s557_s22 }
  0x3c   : > { %3078 = dma.hbm_to_vmem [thread:$0]  (!%p3926_p5), %s524_s27, 1024, %s526_s17, [#allocation13], %s3764_s21, %s3764_s21, %s3765_s14  }
  0x3d   : > { %s3767_s6 = smov 256   ;;  %s3768_s28 = smov 16  }
  0x3e   : > { %s555_s15 = sshll.u32 %s4328_s11, 4  ;;  %s572_s1 = sshll.u32 %s4286_s13, 4  ;;  %s556_s15 = int_to_ptr.hbm [resolvable:$true] %s555_s15  ;;  %s573_s1 = int_to_ptr.hbm [resolvable:$true] %s572_s1 }
  0x3f   : > { %3084 = dma.hbm_to_vmem [thread:$0]  (!%p3926_p5), %s556_s15, 4096, %s558_s22, [#allocation16], %s3767_s6, %s3767_s6, %s3768_s28  }
  0x40   : > { %s3769_s27 = smov [#allocation18]   ;;  %s2496_s3 = sadd.s32 4294967294, %s3751_s30  }
  0x41   : > { %s574_s17 = sshll.u32 %s3769_s27, 4  ;;  %s47_s20 = sadd.s32 1, %s3743_s29  ;;  %s575_s17 = int_to_ptr.vmem [resolvable:$true] %s574_s17 }
  0x42   : > { %3087 = dma.hbm_to_vmem [thread:$0]  (!%p3926_p5), %s573_s1, 4096, %s575_s17, [#allocation19], %s3764_s21, %s3764_s21, %s3765_s14  }
  0x43   : > { %s50_s2 = sadd.s32 1, %s3747_s0  ;;  %p48_p6 = scmp.ge.s32.totalorder %s47_s20, 4 }
  0x44   : > { %s57_s15 = sadd.s32 1, %s3731_s26  ;;  %p64_p7 = scmp.ne.s32.totalorder %s3731_s26, %s3727_s25 }
  0x45   : > { %p65_p8 = scmp.eq.s32.totalorder %s3751_s30, 0  ;;  %s4354_s20 = smov (%p48_p6, %s47_s20), 0 }
  0x46   : > { %s4356_s2 = smov (!%p48_p6, %s50_s2), %s3747_s0  ;;  %p70_p10 = scmp.ne.s32.totalorder %s3727_s25, %s3723_s24 }
  0x47   : > { %p3988_p9 = por %p65_p8, %p64_p7  ;;  %p52_p11 = scmp.ge.s32.totalorder %s4356_s2, 2 }
  0x48   : > { %s4330_s18 = sadd.s32 4294967295, %s3751_s30   ;;  %p3998_p13 = por %p3910_p1, %p70_p10 }
  0x49   : > { %p430_p12 = scmp.eq.s32.totalorder %s4330_s18, 7  ;;  %p436_p0 = scmp.eq.s32.totalorder %s2496_s3, 7 }
  0x4a   : > { %s4358_s2 = smov (%p52_p11, %s4356_s2), 0  ;;  %p3105_p5 = scmp.lt.s32.totalorder %s3751_s30, 8 }
  0x4b   : > { %p4004_p2 = por %p430_p12, %p64_p7  ;;  %p4008_p4 = por %p436_p0, %p70_p10 }
  0x4c   : > { %s54_s28 = ssub.s32 %s3747_s0, %s4358_s2  ;;  %s597_s10 = sand.u32 1, %s3731_s26  }
  0x4d   : > { %p55_p6 = scmp.eq.s32.totalorder %s54_s28, 0  ;;  %s2508_s12 = sshll.u32 %s597_s10, 4 }
  0x4e   : > { %s2922_s27 = sshll.u32 %s3747_s0, 4  ;;  %s4334_s18 = sld [smem:[#allocation30_spill]] }
  0x4f   : > { %s4017_s1 = scalar_select %p55_p6, %s3731_s26, %s57_s15  }
  0x50   : > { %s601_s5 = scalar_lea.vmem [#allocation3], %s2508_s12  ;;  %p3089_p7 = pnand %p3105_p5, %p3988_p9 }
  0x51   : > { %s609_s7 = sshll.u32 %s601_s5, 4  ;;  %s598_s11 = scalar_lea.sflag [#allocation4], %s597_s10  ;;  %s610_s7 = int_to_ptr.vmem [resolvable:$true] %s609_s7 }
  0x52   : > { %621 = sbr.rel (%p3918_p3) target bundleno = 2356 (0x934), region = 88  ;;  %s4031_s15 = sand.u32 (!%p3918_p3), 1, %s3727_s25  }
  0x53   : > { %s2512_s5 = sshll.u32 (!%p3918_p3), %s4031_s15, 4 }
  0x54   : > { %s606_s4 = scalar_lea.hbm %s4334_s18, %s2922_s27  ;;  %s627_s28 = scalar_lea.vmem (!%p3918_p3), [#allocation3], %s2512_s5 }
  0x55   : > { %s607_s8 = sshll.u32 %s606_s4, 4  ;;  %s624_s4 = scalar_lea.sflag (!%p3918_p3), [#allocation4], %s4031_s15  ;;  %s608_s8 = int_to_ptr.hbm [resolvable:$true] %s607_s8 }
  0x56   : > { %3091 = dma.hbm_to_vmem [thread:$0]  (!%p3089_p7), %s608_s8, 256, %s610_s7, %s598_s11, %s4326_s16, %s4326_s16, %s4325_s9  }
  0x57   : > { %3694 = dma.done.wait (%p3998_p13), %s624_s4, 256  }
  0x58   : > { %3696 = vsyncadd (%p3998_p13), %s624_s4, 4294967040 }
  0x59   : > { %3698 = dma.done.wait (%p3910_p1), [#allocation7], 512  }
  0x5a   : > { %3700 = vsyncadd (%p3910_p1), [#allocation7], 4294966784 }
  0x5b   : > { %3702 = dma.done.wait (%p3910_p1), [#allocation10], 32  }
  0x5c   : > { %3704 = vsyncadd (%p3910_p1), [#allocation10], 4294967264 }
  0x5d   : > { %3706 = dma.done.wait (%p3910_p1), [#allocation13], 4096  }
  0x5e   : > { %3708 = vsyncadd (%p3910_p1), [#allocation13], 4294963200 }
  0x5f   : > { %3710 = dma.done.wait (%p3910_p1), [#allocation16], 4112  }
  0x60   : > { %3712 = vsyncadd (%p3910_p1), [#allocation16], 4294963184 }
  0x61   : > { %3714 = dma.done.wait (%p3910_p1), [#allocation19], 4096  }
  0x62   : > { %3716 = vsyncadd (%p3910_p1), [#allocation19], 4294963200  ;;  %s4059_s7 = scalar_lea.vmem [#allocation20], %s2512_s5  ;;  %s4335_s8 = sld [smem:[#allocation28_spill]] }
  0x68   : > { %p2523_p3 = scmp.ne.s32.totalorder %s4335_s8, 0 }
  0x6a   : > { %728 = sbr.rel (%p2523_p3) target bundleno = 114 (0x72), region = 132 }
  0x6f   : > { %v729_v0 = vld [vmem:[%s627_s28] sm:$0xff]  ;;  %v730_v1 = vld [vmem:[%s627_s28 + $0x8] sm:$0xff] }
  0x70   : > { %731 = vst [vmem:[#allocation2] sm:$0xff] %v729_v0 }
  0x71   : > { %732 = vst [vmem:[#allocation2 + $0x8] sm:$0xff] %v730_v1 }
  0x72 PF: > { %v735_v3 = vld [vmem:[#allocation6] sm:$0xff]  ;;  %v736_v6 = vld [vmem:[#allocation6 + $0x8] sm:$0xff]  ;;  %v3770_v8 = vmov 128.0   ;;  %v2945_v24 = vld [vmem:[#allocation12 + $0xb0] sm:$0xf0]  ;;  %s4336_s23 = sld [smem:[#allocation36_spill]] }
  0x73   : > { %3271 = vrcp.f32 %v3770_v8  ;;  %v2610_v23 = vld [vmem:[#allocation12 + $0xa8] sm:$0xf]  ;;  %v2944_v25 = vld [vmem:[#allocation12 + $0xac] sm:$0xf]  ;;  %v2612_v27 = vld [vmem:[#allocation12 + $0xb4] sm:$0xf0] }
  0x74   : > { %v2611_v26 = vor.u32 %v2945_v24, %v2610_v23  ;;  %v2618_v28 = vld [vmem:[#allocation12 + $0xb0] sm:$0xf]  ;;  %v2946_v29 = vld [vmem:[#allocation12 + $0xb8] sm:$0xf0]  ;;  %v2615_v30 = vor.u32 %v2944_v25, %v2612_v27  ;;  %v2941_v34 = vld [vmem:[#allocation12 + $0x94] sm:$0xf] }
  0x75   : > { %v2619_v31 = vor.u32 %v2946_v29, %v2618_v28  ;;  %v2598_v32 = vld [vmem:[#allocation12 + $0x90] sm:$0xf]  ;;  %v2942_v33 = vld [vmem:[#allocation12 + $0x98] sm:$0xf0]  ;;  %v2600_v36 = vld [vmem:[#allocation12 + $0x9c] sm:$0xf0] }
  0x76   : > { %967 = vmatpush.bf16.msra.mxu0 %v2611_v26  ;;  %981 = vmatpush.bf16.msra.mxu1 %v2615_v30  ;;  %v2599_v35 = vor.u32 %v2942_v33, %v2598_v32  ;;  %v2606_v37 = vld [vmem:[#allocation12 + $0x98] sm:$0xf]  ;;  %v2943_v38 = vld [vmem:[#allocation12 + $0xa0] sm:$0xf0]  ;;  %v2603_v39 = vor.u32 %v2941_v34, %v2600_v36  ;;  %v2938_v43 = vld [vmem:[#allocation12 + $0x7c] sm:$0xf] }
  0x77   : > { %v733_v2 = vld [vmem:[#allocation2] sm:$0xff]  ;;  %995 = vmatpush.bf16.msra.mxu2 %v2619_v31  ;;  %v2607_v40 = vor.u32 %v2943_v38, %v2606_v37  ;;  %v2586_v41 = vld [vmem:[#allocation12 + $0x78] sm:$0xf]  ;;  %v2939_v42 = vld [vmem:[#allocation12 + $0x80] sm:$0xf0]  ;;  %s3771_s9 = smov 64  }
  0x78   : > { %v4062_v4 = vadd.f32 %v735_v3, %v733_v2  ;;  %v734_v5 = vld [vmem:[#allocation2 + $0x8] sm:$0xff]  ;;  %v2587_v44 = vor.u32 %v2939_v42, %v2586_v41  ;;  %v2588_v45 = vld [vmem:[#allocation12 + $0x84] sm:$0xf0]  ;;  %v2594_v46 = vld [vmem:[#allocation12 + $0x80] sm:$0xf]  ;;  %s3772_s16 = smov 96  }
  0x79   : > { %v4065_v7 = vadd.f32 %v736_v6, %v734_v5  ;;  %v3272_v9 = vpop.eup %3271  ;;  %v2940_v47 = vld [vmem:[#allocation12 + $0x88] sm:$0xf0]  ;;  %v2591_v48 = vor.u32 %v2938_v43, %v2588_v45  ;;  %v2574_v50 = vld [vmem:[#allocation12 + $0x60] sm:$0xf]  ;;  %v2935_v52 = vld [vmem:[#allocation12 + $0x64] sm:$0xf] }
  0x7a   : > { %741 = vadd.xlane.f32.xlu0 %v4062_v4  ;;  %v746_v10 = vmul.f32 128.0, %v3272_v9  ;;  %vm750_vm0 = vweird.f32 %v3272_v9  ;;  %968 = vmatpush.bf16.msra.mxu0 %v2599_v35  ;;  %v2595_v49 = vor.u32 %v2940_v47, %v2594_v46  ;;  %v2936_v51 = vld [vmem:[#allocation12 + $0x68] sm:$0xf0]  ;;  %v2576_v54 = vld [vmem:[#allocation12 + $0x6c] sm:$0xf0]  ;;  %vm1107_vm7 = vcmask 261120  }
  0x7b   : > { %982 = vmatpush.bf16.msra.mxu1 %v2603_v39  ;;  %996 = vmatpush.bf16.msra.mxu2 %v2607_v40  ;;  %v2575_v53 = vor.u32 %v2936_v51, %v2574_v50  ;;  %v2582_v55 = vld [vmem:[#allocation12 + $0x68] sm:$0xf]  ;;  %v2937_v56 = vld [vmem:[#allocation12 + $0x70] sm:$0xf0]  ;;  %v2579_v57 = vor.u32 %v2935_v52, %v2576_v54  ;;  %v2932_v61 = vld [vmem:[#allocation12 + $0x4c] sm:$0xf] }
  0x7c   : > { %v747_v11 = vsub.f32 1.0, %v746_v10  ;;  %v2583_v58 = vor.u32 %v2937_v56, %v2582_v55  ;;  %v2562_v59 = vld [vmem:[#allocation12 + $0x48] sm:$0xf]  ;;  %v2933_v60 = vld [vmem:[#allocation12 + $0x50] sm:$0xf0]  ;;  %s3773_s22 = smov 32  }
  0x7d   : > { %v2563_v62 = vor.u32 %v2933_v60, %v2562_v59  ;;  %v2564_v63 = vld [vmem:[#allocation12 + $0x54] sm:$0xf0]  ;;  %v2570_v0 = vld [vmem:[#allocation12 + $0x50] sm:$0xf]  ;;  %v2934_v1 = vld [vmem:[#allocation12 + $0x58] sm:$0xf0] }
  0x7e   : > { %v748_v12 = vmul.f32 %v3272_v9, %v747_v11  ;;  %969 = vmatpush.bf16.msra.mxu0 %v2587_v44  ;;  %v2567_v2 = vor.u32 %v2932_v61, %v2564_v63  ;;  %v2571_v3 = vor.u32 %v2934_v1, %v2570_v0  ;;  %v2550_v5 = vld [vmem:[#allocation12 + $0x30] sm:$0xf]  ;;  %v2930_v6 = vld [vmem:[#allocation12 + $0x38] sm:$0xf0]  ;;  %v2929_v8 = vld [vmem:[#allocation12 + $0x34] sm:$0xf] }
  0x7f   : > { %983 = vmatpush.bf16.msra.mxu1 %v2591_v48  ;;  %997 = vmatpush.bf16.msra.mxu2 %v2595_v49  ;;  %v2552_v10 = vld [vmem:[#allocation12 + $0x3c] sm:$0xf0]  ;;  %v2558_v11 = vld [vmem:[#allocation12 + $0x38] sm:$0xf]  ;;  %v2928_v24 = vld [vmem:[#allocation12 + $0x28] sm:$0xf0] }
  0x80   : > { %v749_v13 = vadd.f32 %v3272_v9, %v748_v12  ;;  %v2931_v12 = vld [vmem:[#allocation12 + $0x40] sm:$0xf0]  ;;  %v2546_v23 = vld [vmem:[#allocation12 + $0x20] sm:$0xf]  ;;  %v2924_v28 = vld [vmem:[#allocation12 + $0x8] sm:$0xf0] }
  0x81   : > { %v2547_v26 = vor.u32 %v2928_v24, %v2546_v23  ;;  %v2526_v27 = vld [vmem:[#allocation12] sm:$0xf]  ;;  %v2923_v29 = vld [vmem:[#allocation12 + $0x4] sm:$0xf]  ;;  %v2528_v32 = vld [vmem:[#allocation12 + $0xc] sm:$0xf0] }
  0x82   : > { %743 = vadd.xlane.f32.xlu0 %v4065_v7  ;;  %v4068_v14 = vsel %vm750_vm0, %v3272_v9, %v749_v13  ;;  %970 = vmatpush.bf16.msra.mxu0 %v2575_v53  ;;  %v2551_v9 = vor.u32 %v2930_v6, %v2550_v5  ;;  %v2555_v13 = vor.u32 %v2929_v8, %v2552_v10  ;;  %v2534_v33 = vld [vmem:[#allocation12 + $0x8] sm:$0xf]  ;;  %v2925_v34 = vld [vmem:[#allocation12 + $0x10] sm:$0xf0]  ;;  %v3263_v55 = vld [vmem:[#allocation9] ss:$0 sm:$0xff] }
  0x83   : > { %984 = vmatpush.bf16.msra.mxu1 %v2579_v57  ;;  %998 = vmatpush.bf16.msra.mxu2 %v2583_v58  ;;  %v2527_v31 = vor.u32 %v2924_v28, %v2526_v27  ;;  %v2531_v36 = vor.u32 %v2923_v29, %v2528_v32  ;;  %v2535_v37 = vor.u32 %v2925_v34, %v2534_v33  ;;  %v3264_v60 = vld [vmem:[#allocation11] ss:$0 sm:$0xff]  ;;  %vm1218_vm8 = vcmask 130048   ;;  %s4337_s12 = sld [smem:[#allocation39_spill]] }
  0x84   : > { %vm1453_vm9 = vcmask 523264   ;;  %vm1456_vm10 = vcmask 785408   ;;  %s4338_s3 = sld [smem:[#allocation40_spill]] }
  0x85   : > { %s4339_s4 = sld [smem:[#allocation42_spill]] }
  0x86   : > { %971 = vmatpush.bf16.msra.mxu0 %v2563_v62  ;;  %s4340_s11 = sld [smem:[#allocation43_spill]] }
  0x87   : > { %985 = vmatpush.bf16.msra.mxu1 %v2567_v2  ;;  %999 = vmatpush.bf16.msra.mxu2 %v2571_v3  ;;  %s4342_s21 = sld [smem:[#allocation45_spill]] }
  0x88   : > { %s4343_s10 = sld [smem:[#allocation28_spill]] }
  0x8a   : > { %972 = vmatpush.bf16.msra.mxu0 %v2551_v9 }
  0x8b   : > { %986 = vmatpush.bf16.msra.mxu1 %v2555_v13 }
  0x8e   : > { %p2916_p1 = scmp.ne.s32.totalorder %s4343_s10, 3 }
  0xed   : > { %v742_v15 = vpop.xlane.xlu0 %741 }
  0xee   : > { %v752_v16 = vmul.f32 %v4068_v14, %v742_v15  ;;  %v2559_v15 = vor.u32 %v2931_v12, %v2558_v11 }
  0xf0   : > { %v4072_v17 = vsub.f32 %v4062_v4, %v752_v16  ;;  %1000 = vmatpush.bf16.msra.mxu2 %v2559_v15  ;;  %v2538_v16 = vld [vmem:[#allocation12 + $0x18] sm:$0xf] }
  0xf2   : > { %v756_v18 = vmul.f32 %v4072_v17, %v4072_v17 }
  0xf4   : > { %758 = vadd.xlane.f32.xlu1 %v756_v18  ;;  %v2927_v18 = vld [vmem:[#allocation12 + $0x20] sm:$0xf0]  ;;  %1001 = vmatpush.bf16.msra.mxu2 %v2547_v26 }
  0xf5   : > { %v744_v19 = vpop.xlane.xlu0 %743 }
  0xf6   : > { %v753_v20 = vmul.f32 %v4068_v14, %v744_v19  ;;  %v2926_v19 = vld [vmem:[#allocation12 + $0x1c] sm:$0xf] }
  0xf8   : > { %v4078_v21 = vsub.f32 %v4065_v7, %v753_v20  ;;  %v2539_v20 = vor.u32 %v2927_v18, %v2538_v16  ;;  %1002 = vmatpush.bf16.msra.mxu2 %v2535_v37 }
  0xfa   : > { %v757_v22 = vmul.f32 %v4078_v21, %v4078_v21  ;;  %973 = vmatpush.bf16.msra.mxu0 %v2539_v20 }
  0xfc   : > { %760 = vadd.xlane.f32.xlu1 %v757_v22  ;;  %v2540_v22 = vld [vmem:[#allocation12 + $0x24] sm:$0xf0] }
  0xfd   : > { %v2543_v25 = vor.u32 %v2926_v19, %v2540_v22 }
  0xfe   : > { %974 = vmatpush.bf16.msra.mxu0 %v2527_v31 }
  0xff   : > { %987 = vmatpush.bf16.msra.mxu1 %v2543_v25 }
 0x103   : > { %988 = vmatpush.bf16.msra.mxu1 %v2531_v36 }
 0x167   : > { %v759_v30 = vpop.xlane.xlu1 %758 }
 0x168   : > { %v762_v35 = vmul.f32 %v759_v30, %v4068_v14 }
 0x16a   : > { %v764_v38 = vadd.f32 1e-05, %v762_v35 }
 0x16c   : > { %3273 = vrsqrt.f32 %v764_v38  ;;  %vm772_vm2 = vweird.f32 %v764_v38 }
 0x16f   : > { %v761_v39 = vpop.xlane.xlu1 %760 }
 0x170   : > { %v763_v40 = vmul.f32 %v761_v39, %v4068_v14 }
 0x172   : > { %v3274_v41 = vpop.eup %3273  ;;  %v765_v42 = vadd.f32 1e-05, %v763_v40 }
 0x173   : > { %v767_v43 = vmul.f32 %v3274_v41, %v764_v38  ;;  %vm773_vm1 = vweird.f32 %v3274_v41 }
 0x174   : > { %3275 = vrsqrt.f32 %v765_v42  ;;  %vm774_vm3 = vmor %vm772_vm2, %vm773_vm1  ;;  %vm782_vm5 = vweird.f32 %v765_v42 }
 0x175   : > { %v768_v44 = vmul.f32 %v3274_v41, %v767_v43 }
 0x177   : > { %v769_v45 = vmul.f32 0.5, %v768_v44 }
 0x179   : > { %v770_v46 = vsub.f32 1.5, %v769_v45 }
 0x17a   : > { %v3276_v47 = vpop.eup %3275 }
 0x17b   : > { %v771_v48 = vmul.f32 %v3274_v41, %v770_v46  ;;  %v777_v49 = vmul.f32 %v3276_v47, %v765_v42  ;;  %vm783_vm4 = vweird.f32 %v3276_v47 }
 0x17c   : > { %vm784_vm6 = vmor %vm782_vm5, %vm783_vm4 }
 0x17d   : > { %v778_v50 = vmul.f32 %v3276_v47, %v777_v49  ;;  %v775_v51 = vsel %vm774_vm3, %v3274_v41, %v771_v48 }
 0x17e   : > { %v786_v54 = vmul.f32 %v775_v51, %v4072_v17  ;;  %v831_v17 = vld [vmem:[%s4336_s23] sm:$0x7] }
 0x17f   : > { %v779_v52 = vmul.f32 0.5, %v778_v50  ;;  %v834_v3 = vperm.slane %v831_v17, 1  ;;  %v833_v5 = vperm.slane %v831_v17, 0  ;;  %v835_v9 = vperm.slane %v831_v17, 2 }
 0x180   : > { %v791_v59 = vmul.f32 %v3263_v55, %v786_v54 }
 0x181   : > { %v780_v53 = vsub.f32 1.5, %v779_v52 }
 0x182   : > { %v796_v62 = vadd.f32 %v3264_v60, %v791_v59 }
 0x183   : > { %v781_v56 = vmul.f32 %v3276_v47, %v780_v53 }
 0x185   : > { %v785_v57 = vsel %vm784_vm6, %v3276_v47, %v781_v56 }
 0x186   : > { %v787_v58 = vmul.f32 %v785_v57, %v4078_v21 }
 0x188   : > { %v792_v61 = vmul.f32 %v3263_v55, %v787_v58 }
 0x18a   : > { %v797_v63 = vadd.f32 %v3264_v60, %v792_v61 }
 0x18c   : > { %v798_v0 = vpack.c.bf16 %v797_v63, %v796_v62 }
 0x18e   : > { %975 = vmatmul.bf16.vlgmr.msra.gmra.mxu0 %v798_v0  ;;  %989 = vmatmul.bf16.vlgmr.msra.gmra.mxu1 %v798_v0 }
 0x18f   : > { %1003 = vmatmul.bf16.vlgmr.msra.gmra.mxu2 %v798_v0 }
 0x20b   : > { %v976_v1 = vpop.f32.mrf.mxu0  ;;  %v990_v2 = vpop.f32.mrf.mxu1 }
 0x20c   : > { %v991_v6 = vadd.f32 %v990_v2, %v834_v3  ;;  %v977_v8 = vadd.f32 %v976_v1, %v833_v5 }
 0x20e   : > { %v1059_v15 = vpack.c.bf16 %v991_v6, %v991_v6  ;;  %v1009_v16 = vmul.f32 0.17677669, %v977_v8 }
 0x210   : > { %v1104_v24 = vunpack.c.l.b16 %v1059_v15  ;;  %v1031_v32 = vpack.c.bf16 %v1009_v16, %v1009_v16 }
 0x212   : > { %v1004_v21 = vpop.f32.mrf.mxu2  ;;  %v1099_v38 = vunpack.c.l.b16 %v1031_v32 }
 0x213   : > { %v978_v10 = vpop.f32.mrf.mxu0  ;;  %v992_v11 = vpop.f32.mrf.mxu1  ;;  %v1005_v22 = vadd.f32 %v1004_v21, %v835_v9 }
 0x214   : > { %v979_v12 = vadd.f32 %v978_v10, %v833_v5  ;;  %v993_v13 = vadd.f32 %v992_v11, %v834_v3 }
 0x215   : > { %v1087_v30 = vpack.c.bf16 %v1005_v22, %v1005_v22 }
 0x216   : > { %v1010_v18 = vmul.f32 0.17677669, %v979_v12  ;;  %v3213_v19 = vpack.i.bf16 %v993_v13, %v991_v6  ;;  %v1060_v20 = vpack.c.bf16 %v993_v13, %v993_v13 }
 0x217   : > { %v1322_v36 = vunpack.c.l.b16 %v1087_v30 }
 0x218   : > { %3214 = vrot.lane.b32.xlu0 %v3213_v19, %s3771_s9  ;;  %3204 = vrot.lane.b32.xlu2 %v3213_v19, %s3772_s16  ;;  %v3218_v23 = vpack.i.bf16 %v1010_v18, %v1009_v16  ;;  %v1105_v25 = vunpack.c.l.b16 %v1060_v20  ;;  %v1032_v28 = vpack.c.bf16 %v1010_v18, %v1010_v18 }
 0x21a   : > { %v1006_v26 = vpop.f32.mrf.mxu2  ;;  %3219 = vrot.lane.b32.xlu1 %v3218_v23, %s3771_s9  ;;  %v1106_v27 = vpack.c.b16 %v1105_v25, %v1104_v24  ;;  %v1100_v35 = vunpack.c.l.b16 %v1032_v28 }
 0x21b   : > { %v1007_v29 = vadd.f32 %v1006_v26, %v835_v9 }
 0x21c   : > { %v1112_v31 = vsel %vm1107_vm7, %v1106_v27, 0  ;;  %v1101_v40 = vpack.c.b16 %v1100_v35, %v1099_v38 }
 0x21d   : > { %1121 = vmatpush.bf16.xpose.msra.mxu3 %v1112_v31  ;;  %v1088_v33 = vpack.c.bf16 %v1007_v29, %v1007_v29  ;;  %v4093_v34 = vpack.i.bf16 %v1007_v29, %v1005_v22  ;;  %v1095_v31 = vld [vmem:[#allocation8] sm:$0xff] }
 0x21f   : > { %v1323_v37 = vunpack.c.l.b16 %v1088_v33 }
 0x220   : > { %3209 = vrot.lane.b32.xlu2 %v3218_v23, %s3772_s16 }
 0x221   : > { %v1324_v39 = vpack.c.b16 %v1323_v37, %v1322_v36  ;;  %v1096_v36 = vld [vmem:[#allocation8 + $0x8] sm:$0xff] }
 0x223   : > { %1336 = vmatpush.bf16.msrb.mxu2 %v1324_v39 }
 0x224   : > { %2620 = vmatmul.msk.bf16.vlgmr.msra.gmra.mxu3 %vm1107_vm7, %v1101_v40 }
 0x228   : > { %3224 = vrot.lane.b32.xlu2 %v3213_v19, %s3773_s22 }
 0x230   : > { %3229 = vrot.lane.b32.xlu2 %v3218_v23, %s3773_s22 }
 0x272   : > { %v3205_v41 = vpop.permute.xlu2 %3204 }
 0x273   : > { %v3207_v42 = vunpack.i.h.bf16 %v3205_v41  ;;  %v3206_v43 = vunpack.i.l.bf16 %v3205_v41 }
 0x275   : > { %v1062_v44 = vpack.c.bf16 %v3207_v42, %v3207_v42  ;;  %v1061_v45 = vpack.c.bf16 %v3206_v43, %v3206_v43 }
 0x277   : > { %v1136_v46 = vunpack.c.l.b16 %v1062_v44  ;;  %v1135_v47 = vunpack.c.l.b16 %v1061_v45 }
 0x279   : > { %v1137_v48 = vpack.c.b16 %v1136_v46, %v1135_v47 }
 0x27a   : > { %v3210_v49 = vpop.permute.xlu2 %3209 }
 0x27b   : > { %v3212_v50 = vunpack.i.h.bf16 %v3210_v49  ;;  %v3211_v51 = vunpack.i.l.bf16 %v3210_v49  ;;  %v1142_v52 = vsel %vm1107_vm7, %v1137_v48, 0 }
 0x27c   : > { %1151 = vmatpush.bf16.xpose.msrb.mxu3 %v1142_v52 }
 0x27d   : > { %v1034_v53 = vpack.c.bf16 %v3212_v50, %v3212_v50  ;;  %v1033_v54 = vpack.c.bf16 %v3211_v51, %v3211_v51 }
 0x27f   : > { %v1131_v55 = vunpack.c.l.b16 %v1034_v53  ;;  %v1130_v56 = vunpack.c.l.b16 %v1033_v54 }
 0x281   : > { %v1132_v57 = vpack.c.b16 %v1131_v55, %v1130_v56 }
 0x282   : > { %v3225_v58 = vpop.permute.xlu2 %3224 }
 0x283   : > { %v3227_v59 = vunpack.i.h.bf16 %v3225_v58  ;;  %v3226_v60 = vunpack.i.l.bf16 %v3225_v58  ;;  %2621 = vmatmul.msk.bf16.vlgmr.msrb.gmra.mxu3 %vm1107_vm7, %v1132_v57 }
 0x285   : > { %v1066_v61 = vpack.c.bf16 %v3227_v59, %v3227_v59  ;;  %v1065_v62 = vpack.c.bf16 %v3226_v60, %v3226_v60 }
 0x287   : > { %v1196_v63 = vunpack.c.l.b16 %v1066_v61  ;;  %v1195_v0 = vunpack.c.l.b16 %v1065_v62 }
 0x289   : > { %v1197_v17 = vpack.c.b16 %v1196_v63, %v1195_v0 }
 0x28a   : > { %v3215_v1 = vpop.permute.xlu0 %3214  ;;  %v3230_v2 = vpop.permute.xlu2 %3229 }
 0x28b   : > { %v3217_v3 = vunpack.i.h.bf16 %v3215_v1  ;;  %v3216_v5 = vunpack.i.l.bf16 %v3215_v1  ;;  %v3232_v6 = vunpack.i.h.bf16 %v3230_v2  ;;  %v3231_v8 = vunpack.i.l.bf16 %v3230_v2 }
 0x28c   : > { %v3220_v21 = vpop.permute.xlu1 %3219  ;;  %v1202_v9 = vsel %vm1107_vm7, %v1197_v17, 0 }
 0x28d   : > { %v1064_v10 = vpack.c.bf16 %v3217_v3, %v3217_v3  ;;  %v1063_v11 = vpack.c.bf16 %v3216_v5, %v3216_v5  ;;  %v1038_v12 = vpack.c.bf16 %v3232_v6, %v3232_v6  ;;  %v1037_v13 = vpack.c.bf16 %v3231_v8, %v3231_v8  ;;  %1211 = vmatpush.bf16.xpose.msrb.mxu0 %v1202_v9 }
 0x28e   : > { %v3222_v15 = vunpack.i.h.bf16 %v3220_v21  ;;  %v3221_v16 = vunpack.i.l.bf16 %v3220_v21 }
 0x28f   : > { %v1166_v18 = vunpack.c.l.b16 %v1064_v10  ;;  %v1165_v19 = vunpack.c.l.b16 %v1063_v11  ;;  %v1191_v20 = vunpack.c.l.b16 %v1038_v12  ;;  %v1190_v22 = vunpack.c.l.b16 %v1037_v13 }
 0x290   : > { %v1036_v25 = vpack.c.bf16 %v3222_v15, %v3222_v15  ;;  %v1035_v26 = vpack.c.bf16 %v3221_v16, %v3221_v16 }
 0x291   : > { %v1167_v23 = vpack.c.b16 %v1166_v18, %v1165_v19  ;;  %v1192_v24 = vpack.c.b16 %v1191_v20, %v1190_v22 }
 0x292   : > { %v1161_v28 = vunpack.c.l.b16 %v1036_v25  ;;  %v1160_v29 = vunpack.c.l.b16 %v1035_v26 }
 0x293   : > { %v1172_v27 = vsel %vm1107_vm7, %v1167_v23, 0 }
 0x294   : > { %2623 = vmatmul.msk.bf16.vlgmr.msrb.gmra.mxu0 %vm1107_vm7, %v1192_v24  ;;  %1181 = vmatpush.bf16.xpose.msra.mxu3 %v1172_v27  ;;  %v1162_v30 = vpack.c.b16 %v1161_v28, %v1160_v29 }
 0x29b   : > { %2622 = vmatmul.msk.bf16.vlgmr.msra.gmra.mxu3 %vm1107_vm7, %v1162_v30 }
 0x2a7   : > { %v1123_v32 = vpop.f32.mrf.mxu3 }
 0x2a8   : > { %v1124_v33 = vadd.f32 %v1123_v32, %v1095_v31 }
 0x2aa   : > { %v1219_v35 = vsel %vm1218_vm8, %v1124_v33, -inf }
 0x2ab   : > { %1220 = vmax.xlane.f32.xlu2 %v1219_v35 }
 0x2af   : > { %v1125_v37 = vpop.f32.mrf.mxu3 }
 0x2b0   : > { %v1126_v38 = vadd.f32 %v1125_v37, %v1096_v36 }
 0x2b2   : > { %v1222_v39 = vsel %vm1218_vm8, %v1126_v38, -inf }
 0x2b3   : > { %1223 = vmax.xlane.f32.xlu0 %v1222_v39 }
 0x306   : > { %v1153_v40 = vpop.f32.mrf.mxu3 }
 0x307   : > { %v1154_v41 = vadd.f32 %v1153_v40, %v1095_v31 }
 0x309   : > { %v1225_v42 = vsel %vm1218_vm8, %v1154_v41, -inf }
 0x30a   : > { %1226 = vmax.xlane.f32.xlu1 %v1225_v42 }
 0x30e   : > { %v1155_v43 = vpop.f32.mrf.mxu3 }
 0x30f   : > { %v1156_v44 = vadd.f32 %v1155_v43, %v1096_v36 }
 0x311   : > { %v1213_v45 = vpop.f32.mrf.mxu0  ;;  %v1228_v46 = vsel %vm1218_vm8, %v1156_v44, -inf }
 0x312   : > { %v1214_v47 = vadd.f32 %v1213_v45, %v1095_v31  ;;  %1229 = vmax.xlane.f32.xlu2 %v1228_v46 }
 0x314   : > { %v1237_v48 = vsel %vm1218_vm8, %v1214_v47, -inf }
 0x315   : > { %1238 = vmax.xlane.f32.xlu1 %v1237_v48 }
 0x319   : > { %v1215_v54 = vpop.f32.mrf.mxu0 }
 0x31a   : > { %v1216_v56 = vadd.f32 %v1215_v54, %v1096_v36 }
 0x31c   : > { %v1240_v62 = vsel %vm1218_vm8, %v1216_v56, -inf }
 0x31e   : > { %v1183_v49 = vpop.f32.mrf.mxu3  ;;  %v1221_v50 = vpop.xlane.xlu2 %1220 }
 0x31f   : > { %v1184_v51 = vadd.f32 %v1183_v49, %v1095_v31  ;;  %v1243_v52 = vsub.f32 %v1124_v33, %v1221_v50 }
 0x321   : > { %v1231_v53 = vsel %vm1218_vm8, %v1184_v51, -inf  ;;  %v1251_v55 = vmul.f32 1.442695, %v1243_v52 }
 0x322   : > { %1232 = vmax.xlane.f32.xlu0 %v1231_v53 }
 0x323   : > { %3277 = vpow2.f32 %v1251_v55 }
 0x326   : > { %v1185_v57 = vpop.f32.mrf.mxu3  ;;  %v1224_v58 = vpop.xlane.xlu0 %1223 }
 0x327   : > { %v1186_v59 = vadd.f32 %v1185_v57, %v1096_v36  ;;  %v1244_v60 = vsub.f32 %v1126_v38, %v1224_v58 }
 0x329   : > { %v1253_v61 = vmul.f32 1.442695, %v1244_v60  ;;  %v1234_v63 = vsel %vm1218_vm8, %v1186_v59, -inf  ;;  %v3278_v0 = vpop.eup %3277 }
 0x32a   : > { %1241 = vmax.xlane.f32.xlu0 %v1240_v62  ;;  %1235 = vmax.xlane.f32.xlu2 %v1234_v63  ;;  %v1267_v1 = vsel %vm1218_vm8, %v3278_v0, 0.0 }
 0x32b   : > { %3279 = vpow2.f32 %v1253_v61 }
 0x331   : > { %v3280_v17 = vpop.eup %3279 }
 0x332   : > { %1268 = vadd.xlane.f32.xlu2 %v1267_v1  ;;  %v1270_v2 = vsel %vm1218_vm8, %v3280_v17, 0.0 }
 0x333   : > { %1271 = vadd.xlane.f32.xlu1 %v1270_v2 }
 0x37d   : > { %v1227_v3 = vpop.xlane.xlu1 %1226 }
 0x37e   : > { %v1245_v5 = vsub.f32 %v1154_v41, %v1227_v3 }
 0x380   : > { %v1255_v6 = vmul.f32 1.442695, %v1245_v5 }
 0x382   : > { %3281 = vpow2.f32 %v1255_v6 }
 0x385   : > { %v1230_v8 = vpop.xlane.xlu2 %1229 }
 0x386   : > { %v1246_v21 = vsub.f32 %v1156_v44, %v1230_v8 }
 0x388   : > { %v3282_v9 = vpop.eup %3281  ;;  %v1257_v10 = vmul.f32 1.442695, %v1246_v21  ;;  %v1239_v11 = vpop.xlane.xlu1 %1238 }
 0x389   : > { %v1249_v12 = vsub.f32 %v1214_v47, %v1239_v11  ;;  %v1273_v13 = vsel %vm1218_vm8, %v3282_v9, 0.0 }
 0x38a   : > { %3283 = vpow2.f32 %v1257_v10  ;;  %1274 = vadd.xlane.f32.xlu0 %v1273_v13 }
 0x38b   : > { %v1263_v15 = vmul.f32 1.442695, %v1249_v12 }
 0x38d   : > { %3285 = vpow2.f32 %v1263_v15 }
 0x390   : > { %v3284_v16 = vpop.eup %3283 }
 0x391   : > { %v1276_v18 = vsel %vm1218_vm8, %v3284_v16, 0.0 }
 0x392   : > { %1277 = vadd.xlane.f32.xlu2 %v1276_v18 }
 0x393   : > { %v4117_v19 = vpop.eup %3285 }
 0x394   : > { %v1285_v20 = vsel %vm1218_vm8, %v4117_v19, 0.0 }
 0x395   : > { %1286 = vadd.xlane.f32.xlu0 %v1285_v20  ;;  %v1233_v22 = vpop.xlane.xlu0 %1232 }
 0x396   : > { %v1247_v23 = vsub.f32 %v1184_v51, %v1233_v22 }
 0x398   : > { %v1259_v24 = vmul.f32 1.442695, %v1247_v23 }
 0x39a   : > { %3287 = vpow2.f32 %v1259_v24 }
 0x39d   : > { %v1242_v25 = vpop.xlane.xlu0 %1241  ;;  %v1236_v26 = vpop.xlane.xlu2 %1235 }
 0x39e   : > { %v1250_v27 = vsub.f32 %v1216_v56, %v1242_v25  ;;  %v1248_v30 = vsub.f32 %v1186_v59, %v1236_v26 }
 0x3a0   : > { %v3288_v28 = vpop.eup %3287  ;;  %v1265_v29 = vmul.f32 1.442695, %v1250_v27  ;;  %v1261_v32 = vmul.f32 1.442695, %v1248_v30 }
 0x3a1   : > { %v1279_v31 = vsel %vm1218_vm8, %v3288_v28, 0.0 }
 0x3a2   : > { %3289 = vpow2.f32 %v1265_v29  ;;  %1280 = vadd.xlane.f32.xlu1 %v1279_v31 }
 0x3a5   : > { %v1269_v33 = vpop.xlane.xlu2 %1268 }
 0x3a6   : > { %3291 = vrcp.f32 %v1269_v33  ;;  %v1272_v35 = vpop.xlane.xlu1 %1271 }
 0x3a7   : > { %3293 = vrcp.f32 %v1272_v35 }
 0x3a8   : > { %v4122_v36 = vpop.eup %3289  ;;  %3295 = vpow2.f32 %v1261_v32 }
 0x3a9   : > { %v1288_v37 = vsel %vm1218_vm8, %v4122_v36, 0.0 }
 0x3aa   : > { %1289 = vadd.xlane.f32.xlu0 %v1288_v37  ;;  %3234 = vrot.lane.b32.xlu2 %v4093_v34, %s3772_s16 }
 0x3ac   : > { %v3292_v38 = vpop.eup %3291 }
 0x3ad   : > { %v3294_v39 = vpop.eup %3293  ;;  %v1299_v40 = vmul.f32 %v3292_v38, %v3278_v0 }
 0x3ae   : > { %v3296_v41 = vpop.eup %3295  ;;  %v1300_v42 = vmul.f32 %v3294_v39, %v3280_v17 }
 0x3af   : > { %v1307_v43 = vpack.c.bf16 %v1299_v40, %v1299_v40  ;;  %v1282_v46 = vsel %vm1218_vm8, %v3296_v41, 0.0 }
 0x3b0   : > { %v1308_v44 = vpack.c.bf16 %v1300_v42, %v1300_v42 }
 0x3b1   : > { %v1317_v45 = vunpack.c.l.b16 %v1307_v43 }
 0x3b2   : > { %v1318_v47 = vunpack.c.l.b16 %v1308_v44  ;;  %1283 = vadd.xlane.f32.xlu0 %v1282_v46 }
 0x3b4   : > { %v1319_v48 = vpack.c.b16 %v1318_v47, %v1317_v45 }
 0x3b6   : > { %2624 = vmatmul.msk.bf16.vlgmr.msrb.gmra.mxu2 %vm1218_vm8, %v1319_v48 }
 0x3bb   : > { %3239 = vrot.lane.b32.xlu1 %v4093_v34, %s3771_s9 }
 0x3c6   : > { %3244 = vrot.lane.b32.xlu0 %v4093_v34, %s3773_s22 }
 0x3fd   : > { %v1275_v49 = vpop.xlane.xlu0 %1274 }
 0x3fe   : > { %3297 = vrcp.f32 %v1275_v49 }
 0x404   : > { %v3298_v51 = vpop.eup %3297 }
 0x405   : > { %v1278_v50 = vpop.xlane.xlu2 %1277  ;;  %v1301_v53 = vmul.f32 %v3298_v51, %v3282_v9 }
 0x406   : > { %3299 = vrcp.f32 %v1278_v50 }
 0x407   : > { %v1309_v61 = vpack.c.bf16 %v1301_v53, %v1301_v53 }
 0x408   : > { %v1287_v1 = vpop.xlane.xlu0 %1286 }
 0x409   : > { %v1345_v34 = vunpack.c.l.b16 %v1309_v61  ;;  %v2949_v61 = vld [vmem:[#allocation14 + $0x10] sm:$0xff] }
 0x40c   : > { %v3300_v52 = vpop.eup %3299 }
 0x40d   : > { %v1302_v54 = vmul.f32 %v3300_v52, %v3284_v16  ;;  %v3235_v55 = vpop.permute.xlu2 %3234 }
 0x40e   : > { %v3237_v56 = vunpack.i.h.bf16 %v3235_v55  ;;  %v3236_v57 = vunpack.i.l.bf16 %v3235_v55 }
 0x40f   : > { %v1310_v58 = vpack.c.bf16 %v1302_v54, %v1302_v54 }
 0x410   : > { %v1090_v59 = vpack.c.bf16 %v3237_v56, %v3237_v56  ;;  %v1089_v60 = vpack.c.bf16 %v3236_v57, %v3236_v57  ;;  %v2954_v56 = vld [vmem:[#allocation14 + $0x38] sm:$0xff]  ;;  %v2953_v57 = vld [vmem:[#allocation14 + $0x30] sm:$0xff] }
 0x411   : > { %v1346_v0 = vunpack.c.l.b16 %v1310_v58  ;;  %1528 = vmatpush.bf16.msrb.mxu1 %v2954_v56  ;;  %v2952_v58 = vld [vmem:[#allocation14 + $0x28] sm:$0xff]  ;;  %v2742_v56 = vld [vmem:[#allocation17 + $0xa0] sm:$0xf] }
 0x412   : > { %v1351_v62 = vunpack.c.l.b16 %v1090_v59  ;;  %v1350_v63 = vunpack.c.l.b16 %v1089_v60  ;;  %v2951_v59 = vld [vmem:[#allocation14 + $0x20] sm:$0xff]  ;;  %v2950_v60 = vld [vmem:[#allocation14 + $0x18] sm:$0xff] }
 0x413   : > { %v1347_v2 = vpack.c.b16 %v1346_v0, %v1345_v34 }
 0x414   : > { %v1352_v17 = vpack.c.b16 %v1351_v62, %v1350_v63  ;;  %v2948_v62 = vld [vmem:[#allocation14 + $0x8] sm:$0xff]  ;;  %v2947_v63 = vld [vmem:[#allocation14] sm:$0xff] }
 0x415   : > { %v1281_v5 = vpop.xlane.xlu1 %1280  ;;  %1529 = vmatpush.bf16.msrb.mxu1 %v2953_v57  ;;  %v2977_v57 = vld [vmem:[#allocation17 + $0xac] sm:$0xf0] }
 0x416   : > { %1364 = vmatpush.bf16.msra.mxu2 %v1352_v17  ;;  %3301 = vrcp.f32 %v1281_v5 }
 0x419   : > { %2625 = vmatmul.msk.bf16.vlgmr.msra.gmra.mxu2 %vm1218_vm8, %v1347_v2  ;;  %1530 = vmatpush.bf16.msrb.mxu1 %v2952_v58  ;;  %v2975_v58 = vld [vmem:[#allocation17 + $0xa4] sm:$0xf] }
 0x41c   : > { %v3302_v8 = vpop.eup %3301 }
 0x41d   : > { %v1290_v3 = vpop.xlane.xlu0 %1289  ;;  %v1303_v9 = vmul.f32 %v3302_v8, %v3288_v28  ;;  %1531 = vmatpush.bf16.msrb.mxu1 %v2951_v59  ;;  %v2743_v59 = vor.u32 %v2977_v57, %v2742_v56  ;;  %v2688_v56 = vld [vmem:[#allocation17 + $0x38] sm:$0xf0]  ;;  %v2662_v57 = vld [vmem:[#allocation17] sm:$0xf] }
 0x41f   : > { %v1311_v20 = vpack.c.bf16 %v1303_v9, %v1303_v9 }
 0x421   : > { %v1373_v29 = vunpack.c.l.b16 %v1311_v20  ;;  %1532 = vmatpush.bf16.msrb.mxu1 %v2950_v60  ;;  %v2744_v60 = vld [vmem:[#allocation17 + $0xb0] sm:$0xf0] }
 0x425   : > { %v1284_v6 = vpop.xlane.xlu0 %1283  ;;  %1533 = vmatpush.bf16.msrb.mxu1 %v2949_v61  ;;  %v2750_v61 = vld [vmem:[#allocation17 + $0xa8] sm:$0xf] }
 0x426   : > { %3303 = vrcp.f32 %v1284_v6 }
 0x427   : > { %3305 = vrcp.f32 %v1290_v3 }
 0x428   : > { %3307 = vrcp.f32 %v1287_v1 }
 0x429   : > { %1534 = vmatpush.bf16.msrb.mxu1 %v2948_v62  ;;  %v2978_v62 = vld [vmem:[#allocation17 + $0xb4] sm:$0xf0] }
 0x42c   : > { %v3304_v21 = vpop.eup %3303 }
 0x42d   : > { %v1304_v10 = vmul.f32 %v3304_v21, %v3296_v41  ;;  %v3240_v11 = vpop.permute.xlu1 %3239  ;;  %v3306_v24 = vpop.eup %3305  ;;  %1535 = vmatpush.bf16.msrb.mxu1 %v2947_v63  ;;  %v2747_v63 = vor.u32 %v2975_v58, %v2744_v60  ;;  %v2957_v60 = vld [vmem:[#allocation17 + $0xc] sm:$0xf0] }
 0x42e   : > { %v3242_v12 = vunpack.i.h.bf16 %v3240_v11  ;;  %v3241_v13 = vunpack.i.l.bf16 %v3240_v11  ;;  %v3308_v27 = vpop.eup %3307  ;;  %v1306_v30 = vmul.f32 %v3306_v24, %v4122_v36 }
 0x42f   : > { %v1312_v15 = vpack.c.bf16 %v1304_v10, %v1304_v10  ;;  %v1305_v31 = vmul.f32 %v3308_v27, %v4117_v19 }
 0x430   : > { %v1092_v16 = vpack.c.bf16 %v3242_v12, %v3242_v12  ;;  %v1091_v18 = vpack.c.bf16 %v3241_v13, %v3241_v13  ;;  %v1314_v37 = vpack.c.bf16 %v1306_v30, %v1306_v30 }
 0x431   : > { %v1374_v25 = vunpack.c.l.b16 %v1312_v15  ;;  %v1313_v40 = vpack.c.bf16 %v1305_v31, %v1305_v31 }
 0x432   : > { %v1379_v22 = vunpack.c.l.b16 %v1092_v16  ;;  %v1378_v23 = vunpack.c.l.b16 %v1091_v18  ;;  %v1402_v43 = vunpack.c.l.b16 %v1314_v37  ;;  %v3265_v16 = vld [vmem:[#allocation15] ss:$0 sm:$0xff] }
 0x433   : > { %v1375_v28 = vpack.c.b16 %v1374_v25, %v1373_v29  ;;  %v1401_v45 = vunpack.c.l.b16 %v1313_v40  ;;  %v2986_v40 = vld [vmem:[#allocation17 + $0xf4] sm:$0xf0] }
 0x434   : > { %v1380_v26 = vpack.c.b16 %v1379_v22, %v1378_v23 }
 0x435   : > { %v1403_v36 = vpack.c.b16 %v1402_v43, %v1401_v45  ;;  %v2984_v43 = vld [vmem:[#allocation17 + $0xec] sm:$0xf] }
 0x436   : > { %1392 = vmatpush.bf16.msrb.mxu3 %v1380_v26 }
 0x438   : > { %v3245_v32 = vpop.permute.xlu0 %3244 }
 0x439   : > { %v3247_v33 = vunpack.i.h.bf16 %v3245_v32  ;;  %v3246_v35 = vunpack.i.l.bf16 %v3245_v32  ;;  %2626 = vmatmul.msk.bf16.vlgmr.msrb.gmra.mxu3 %vm1218_vm8, %v1375_v28  ;;  %v1338_v46 = vpop.f32.mrf.mxu2  ;;  %v2774_v32 = vld [vmem:[#allocation17 + $0xe0] sm:$0xf] }
 0x43b   : > { %v1094_v38 = vpack.c.bf16 %v3247_v33, %v3247_v33  ;;  %v1093_v39 = vpack.c.bf16 %v3246_v35, %v3246_v35  ;;  %v2985_v33 = vld [vmem:[#allocation17 + $0xec] sm:$0xf0]  ;;  %v2983_v35 = vld [vmem:[#allocation17 + $0xe4] sm:$0xf] }
 0x43c   : > { %v2775_v37 = vor.u32 %v2985_v33, %v2774_v32  ;;  %v2694_v33 = vld [vmem:[#allocation17 + $0x40] sm:$0xf] }
 0x43d   : > { %v1407_v41 = vunpack.c.l.b16 %v1094_v38  ;;  %v1406_v42 = vunpack.c.l.b16 %v1093_v39  ;;  %v2776_v38 = vld [vmem:[#allocation17 + $0xf0] sm:$0xf0]  ;;  %v2782_v39 = vld [vmem:[#allocation17 + $0xe8] sm:$0xf] }
 0x43e   : > { %1799 = vmatpush.bf16.msrb.mxu2 %v2775_v37  ;;  %v2963_v37 = vld [vmem:[#allocation17 + $0x44] sm:$0xf] }
 0x43f   : > { %v1408_v44 = vpack.c.b16 %v1407_v41, %v1406_v42  ;;  %v2779_v41 = vor.u32 %v2983_v35, %v2776_v38  ;;  %v2783_v42 = vor.u32 %v2986_v40, %v2782_v39  ;;  %v2965_v35 = vld [vmem:[#allocation17 + $0x4c] sm:$0xf0]  ;;  %v2696_v39 = vld [vmem:[#allocation17 + $0x50] sm:$0xf0]  ;;  %v2702_v40 = vld [vmem:[#allocation17 + $0x48] sm:$0xf] }
 0x440   : > { %v2695_v38 = vor.u32 %v2965_v35, %v2694_v33  ;;  %v3267_v35 = vld [vmem:[%s4338_s3] ss:$0 sm:$0xff] }
 0x441   : > { %1420 = vmatpush.bf16.msra.mxu0 %v1408_v44  ;;  %v1340_v19 = vpop.f32.mrf.mxu2  ;;  %v2784_v44 = vld [vmem:[#allocation17 + $0xf8] sm:$0xf0]  ;;  %1813 = vmatpush.bf16.msra.mxu3 %v2779_v41  ;;  %v2966_v41 = vld [vmem:[#allocation17 + $0x54] sm:$0xf0] }
 0x442   : > { %v2787_v45 = vor.u32 %v2984_v43, %v2784_v44  ;;  %v2703_v43 = vor.u32 %v2966_v41, %v2702_v40  ;;  %v2964_v44 = vld [vmem:[#allocation17 + $0x4c] sm:$0xf]  ;;  %v3018_v41 = vld [vmem:[#allocation18 + $0xf8] sm:$0xff] }
 0x444   : > { %2627 = vmatmul.msk.bf16.vlgmr.msra.gmra.mxu0 %vm1218_vm8, %v1403_v36  ;;  %v2758_v36 = vld [vmem:[#allocation17 + $0xc0] sm:$0xf]  ;;  %1841 = vmatpush.bf16.msra.mxu1 %v2787_v45  ;;  %v2704_v45 = vld [vmem:[#allocation17 + $0x58] sm:$0xf0] }
 0x445   : > { %1827 = vmatpush.bf16.msrb.mxu0 %v2783_v42  ;;  %v2699_v42 = vor.u32 %v2963_v37, %v2696_v39 }
 0x49c   : > { %v1366_v47 = vpop.f32.mrf.mxu2 }
 0x4a4   : > { %v1368_v48 = vpop.f32.mrf.mxu2 }
 0x4a5   : > { %v3248_v49 = vpack.i.bf16 %v1368_v48, %v1366_v47  ;;  %v2760_v48 = vld [vmem:[#allocation17 + $0xd0] sm:$0xf0] }
 0x4a7   : > { %3249 = vrot.lane.b32.xlu2 %v3248_v49, %s3773_s22  ;;  %v2766_v49 = vld [vmem:[#allocation17 + $0xc8] sm:$0xf] }
 0x4bc   : > { %v1394_v50 = vpop.f32.mrf.mxu3 }
 0x4c1   : > { %v1422_v51 = vpop.f32.mrf.mxu0 }
 0x4c4   : > { %v1396_v52 = vpop.f32.mrf.mxu3 }
 0x4c5   : > { %v3253_v53 = vpack.i.bf16 %v1396_v52, %v1394_v50  ;;  %v2982_v50 = vld [vmem:[#allocation17 + $0xd4] sm:$0xf0] }
 0x4c6   : > { %v2767_v52 = vor.u32 %v2982_v50, %v2766_v49  ;;  %v2680_v49 = vld [vmem:[#allocation17 + $0x30] sm:$0xf0]  ;;  %v2686_v50 = vld [vmem:[#allocation17 + $0x28] sm:$0xf] }
 0x4c7   : > { %3254 = vrot.lane.b32.xlu1 %v3253_v53, %s3771_s9  ;;  %v2980_v53 = vld [vmem:[#allocation17 + $0xcc] sm:$0xf]  ;;  %s4341_s9 = sld [smem:[#allocation44_spill]] }
 0x4c8   : > { %1828 = vmatpush.bf16.msrb.mxu0 %v2767_v52 }
 0x4c9   : > { %v1424_v54 = vpop.f32.mrf.mxu0 }
 0x4ca   : > { %v3258_v55 = vpack.i.bf16 %v1424_v54, %v1422_v51  ;;  %v2768_v54 = vld [vmem:[#allocation17 + $0xd8] sm:$0xf0] }
 0x4cc   : > { %3259 = vrot.lane.b32.xlu2 %v3258_v55, %s3772_s16  ;;  %v2771_v55 = vor.u32 %v2980_v53, %v2768_v54 }
 0x4ce   : > { %1842 = vmatpush.bf16.msra.mxu1 %v2771_v55  ;;  %v2960_v55 = vld [vmem:[#allocation17 + $0x2c] sm:$0xf] }
 0x501   : > { %v3250_v0 = vpop.permute.xlu2 %3249 }
 0x502   : > { %v3252_v17 = vunpack.i.h.bf16 %v3250_v0  ;;  %v3251_v34 = vunpack.i.l.bf16 %v3250_v0  ;;  %v2751_v0 = vor.u32 %v2978_v62, %v2750_v61  ;;  %v2955_v61 = vld [vmem:[#allocation17 + $0x4] sm:$0xf]  ;;  %v2664_v62 = vld [vmem:[#allocation17 + $0x10] sm:$0xf0] }
 0x504   : > { %v1452_v6 = vsel %vm1107_vm7, %v1340_v19, %v3252_v17  ;;  %v1451_v8 = vsel %vm1107_vm7, %v1338_v46, %v3251_v34  ;;  %v2981_v46 = vld [vmem:[#allocation17 + $0xcc] sm:$0xf0]  ;;  %v2979_v19 = vld [vmem:[#allocation17 + $0xc4] sm:$0xf]  ;;  %v2976_v17 = vld [vmem:[#allocation17 + $0xac] sm:$0xf]  ;;  %1829 = vmatpush.bf16.msrb.mxu0 %v2751_v0  ;;  %v2667_v0 = vor.u32 %v2955_v61, %v2664_v62 }
 0x505   : > { %v2759_v47 = vor.u32 %v2981_v46, %v2758_v36  ;;  %v2763_v51 = vor.u32 %v2979_v19, %v2760_v48  ;;  %v2752_v34 = vld [vmem:[#allocation17 + $0xb8] sm:$0xf0]  ;;  %v2707_v36 = vor.u32 %v2964_v44, %v2704_v45  ;;  %v2678_v46 = vld [vmem:[#allocation17 + $0x20] sm:$0xf]  ;;  %v2961_v19 = vld [vmem:[#allocation17 + $0x2c] sm:$0xf0] }
 0x506   : > { %v2679_v48 = vor.u32 %v2961_v19, %v2678_v46  ;;  %v3002_v44 = vld [vmem:[#allocation18 + $0x78] sm:$0xff]  ;;  %v3008_v45 = vld [vmem:[#allocation18 + $0xa8] sm:$0xff]  ;;  %v2993_v46 = vld [vmem:[#allocation18 + $0x30] sm:$0xff] }
 0x507   : > { %1800 = vmatpush.bf16.msrb.mxu2 %v2759_v47  ;;  %1814 = vmatpush.bf16.msra.mxu3 %v2763_v51  ;;  %v2959_v47 = vld [vmem:[#allocation17 + $0x24] sm:$0xf]  ;;  %v2962_v51 = vld [vmem:[#allocation17 + $0x34] sm:$0xf0]  ;;  %v3001_v19 = vld [vmem:[#allocation18 + $0x70] sm:$0xff] }
 0x508   : > { %v2683_v53 = vor.u32 %v2959_v47, %v2680_v49  ;;  %v2687_v54 = vor.u32 %v2962_v51, %v2686_v50  ;;  %v3007_v47 = vld [vmem:[#allocation18 + $0xa0] sm:$0xff]  ;;  %v2992_v49 = vld [vmem:[#allocation18 + $0x28] sm:$0xff]  ;;  %v3006_v51 = vld [vmem:[#allocation18 + $0x98] sm:$0xff] }
 0x509   : > { %v3000_v50 = vld [vmem:[#allocation18 + $0x68] sm:$0xff]  ;;  %v2989_v62 = vld [vmem:[#allocation18 + $0x10] sm:$0xff] }
 0x50a   : > { %v4177_v61 = vld [vmem:[%s4339_s4] sm:$0xf] }
 0x50b   : > { %1801 = vmatpush.bf16.msrb.mxu2 %v2743_v59  ;;  %1815 = vmatpush.bf16.msra.mxu3 %v2747_v63  ;;  %v2691_v59 = vor.u32 %v2960_v55, %v2688_v56  ;;  %v2663_v63 = vor.u32 %v2957_v60, %v2662_v57  ;;  %v3005_v55 = vld [vmem:[#allocation18 + $0x90] sm:$0xff]  ;;  %v2990_v57 = vld [vmem:[#allocation18 + $0x18] sm:$0xff]  ;;  %v3012_v60 = vld [vmem:[#allocation18 + $0xc8] sm:$0xff] }
 0x50c   : > { %v3013_v56 = vld [vmem:[#allocation18 + $0xd0] sm:$0xff] }
 0x526   : > { %v3260_v1 = vpop.permute.xlu2 %3259 }
 0x527   : > { %v3262_v21 = vunpack.i.h.bf16 %v3260_v1  ;;  %v3261_v9 = vunpack.i.l.bf16 %v3260_v1  ;;  %v2755_v1 = vor.u32 %v2976_v17, %v2752_v34  ;;  %v2670_v17 = vld [vmem:[#allocation17 + $0x8] sm:$0xf]  ;;  %v2958_v34 = vld [vmem:[#allocation17 + $0x14] sm:$0xf0] }
 0x529   : > { %1843 = vmatpush.bf16.msra.mxu1 %v2755_v1  ;;  %v2956_v1 = vld [vmem:[#allocation17 + $0xc] sm:$0xf] }
 0x539   : > { %v3255_v2 = vpop.permute.xlu1 %3254 }
 0x53a   : > { %v3257_v3 = vunpack.i.h.bf16 %v3255_v2  ;;  %v3256_v5 = vunpack.i.l.bf16 %v3255_v2  ;;  %v2726_v2 = vld [vmem:[#allocation17 + $0x80] sm:$0xf] }
 0x53c   : > { %v1454_v10 = vsel %vm1453_vm9, %v1451_v8, %v3256_v5  ;;  %v1455_v11 = vsel %vm1453_vm9, %v1452_v6, %v3257_v3  ;;  %v2973_v3 = vld [vmem:[#allocation17 + $0x8c] sm:$0xf0]  ;;  %v2971_v5 = vld [vmem:[#allocation17 + $0x84] sm:$0xf]  ;;  %v2728_v8 = vld [vmem:[#allocation17 + $0x90] sm:$0xf0] }
 0x53d   : > { %v1457_v12 = vsel %vm1456_vm10, %v1454_v10, %v3261_v9  ;;  %v1458_v13 = vsel %vm1456_vm10, %v1455_v11, %v3262_v21  ;;  %v2727_v6 = vor.u32 %v2973_v3, %v2726_v2  ;;  %v2734_v21 = vld [vmem:[#allocation17 + $0x88] sm:$0xf]  ;;  %v2974_v9 = vld [vmem:[#allocation17 + $0x94] sm:$0xf0]  ;;  %v2731_v10 = vor.u32 %v2971_v5, %v2728_v8  ;;  %v2672_v5 = vld [vmem:[#allocation17 + $0x18] sm:$0xf0] }
 0x53e   : > { %v1459_v15 = vpack.c.bf16 %v1458_v13, %v1457_v12  ;;  %v2735_v11 = vor.u32 %v2974_v9, %v2734_v21  ;;  %v2972_v12 = vld [vmem:[#allocation17 + $0x8c] sm:$0xf]  ;;  %v2736_v13 = vld [vmem:[#allocation17 + $0x98] sm:$0xf0]  ;;  %v2671_v3 = vor.u32 %v2958_v34, %v2670_v17  ;;  %v3011_v17 = vld [vmem:[#allocation18 + $0xc0] sm:$0xff]  ;;  %v1633_v34 = vperm.slane %v4177_v61, 2 }
 0x53f   : > { %1802 = vmatpush.bf16.msrb.mxu2 %v2727_v6  ;;  %1816 = vmatpush.bf16.msra.mxu3 %v2731_v10  ;;  %v2675_v6 = vor.u32 %v2956_v1, %v2672_v5  ;;  %v1634_v1 = vperm.slane %v4177_v61, 3 }
 0x540   : > { %1536 = vmatmul.bf16.vlgmr.msrb.gmra.mxu1 %v1459_v15  ;;  %v2739_v15 = vor.u32 %v2972_v12, %v2736_v13  ;;  %1830 = vmatpush.bf16.msrb.mxu0 %v2735_v11 }
 0x542   : > { %1844 = vmatpush.bf16.msra.mxu1 %v2739_v15 }
 0x5bd   : > { %v1537_v18 = vpop.f32.mrf.mxu1 }
 0x5be   : > { %v1538_v20 = vadd.f32 %v3265_v16, %v1537_v18  ;;  %v2969_v18 = vld [vmem:[#allocation17 + $0x6c] sm:$0xf0] }
 0x5c0   : > { %v4145_v22 = vadd.f32 %v1538_v20, %v4062_v4  ;;  %v2967_v20 = vld [vmem:[#allocation17 + $0x64] sm:$0xf] }
 0x5c2   : > { %1546 = vadd.xlane.f32.xlu1 %v4145_v22 }
 0x5c5   : > { %v1539_v23 = vpop.f32.mrf.mxu1 }
 0x5c6   : > { %v1540_v24 = vadd.f32 %v3265_v16, %v1539_v23  ;;  %v2710_v16 = vld [vmem:[#allocation17 + $0x60] sm:$0xf] }
 0x5c7   : > { %v2711_v23 = vor.u32 %v2969_v18, %v2710_v16 }
 0x5c8   : > { %v4149_v25 = vadd.f32 %v1540_v24, %v4065_v7  ;;  %v2712_v24 = vld [vmem:[#allocation17 + $0x70] sm:$0xf0] }
 0x5c9   : > { %1803 = vmatpush.bf16.msrb.mxu2 %v2711_v23 }
 0x5ca   : > { %1548 = vadd.xlane.f32.xlu2 %v4149_v25 }
 0x5cd   : > { %1804 = vmatpush.bf16.msrb.mxu2 %v2695_v38 }
 0x5d1   : > { %1805 = vmatpush.bf16.msrb.mxu2 %v2679_v48  ;;  %v3015_v48 = vld [vmem:[#allocation18 + $0xe0] sm:$0xff] }
 0x5d5   : > { %1806 = vmatpush.bf16.msrb.mxu2 %v2663_v63  ;;  %v2997_v63 = vld [vmem:[#allocation18 + $0x50] sm:$0xff] }
 0x635   : > { %v1547_v26 = vpop.xlane.xlu1 %1546 }
 0x636   : > { %v1550_v27 = vmul.f32 %v1547_v26, %v4068_v14  ;;  %v2718_v26 = vld [vmem:[#allocation17 + $0x68] sm:$0xf] }
 0x638   : > { %v4154_v29 = vsub.f32 %v4145_v22, %v1550_v27  ;;  %v2970_v27 = vld [vmem:[#allocation17 + $0x74] sm:$0xf0] }
 0x63a   : > { %v1554_v30 = vmul.f32 %v4154_v29, %v4154_v29 }
 0x63c   : > { %1556 = vadd.xlane.f32.xlu0 %v1554_v30  ;;  %v2715_v30 = vor.u32 %v2967_v20, %v2712_v24 }
 0x63d   : > { %v1549_v4 = vpop.xlane.xlu2 %1548 }
 0x63e   : > { %v1551_v28 = vmul.f32 %v1549_v4, %v4068_v14  ;;  %v2719_v4 = vor.u32 %v2970_v27, %v2718_v26  ;;  %1817 = vmatpush.bf16.msra.mxu3 %v2715_v30 }
 0x640   : > { %v4160_v31 = vsub.f32 %v4149_v25, %v1551_v28  ;;  %v2968_v28 = vld [vmem:[#allocation17 + $0x6c] sm:$0xf]  ;;  %1831 = vmatpush.bf16.msrb.mxu0 %v2719_v4  ;;  %v3266_v4 = vld [vmem:[%s4337_s12] ss:$0 sm:$0xff] }
 0x642   : > { %v1555_v7 = vmul.f32 %v4160_v31, %v4160_v31  ;;  %1818 = vmatpush.bf16.msra.mxu3 %v2699_v42  ;;  %v3009_v42 = vld [vmem:[#allocation18 + $0xb0] sm:$0xff] }
 0x644   : > { %1558 = vadd.xlane.f32.xlu1 %v1555_v7  ;;  %v2720_v7 = vld [vmem:[#allocation17 + $0x78] sm:$0xf0]  ;;  %1832 = vmatpush.bf16.msrb.mxu0 %v2703_v43  ;;  %v3017_v43 = vld [vmem:[#allocation18 + $0xf0] sm:$0xff] }
 0x645   : > { %v2723_v32 = vor.u32 %v2968_v28, %v2720_v7 }
 0x646   : > { %1819 = vmatpush.bf16.msra.mxu3 %v2683_v53  ;;  %v2991_v53 = vld [vmem:[#allocation18 + $0x20] sm:$0xff] }
 0x647   : > { %1845 = vmatpush.bf16.msra.mxu1 %v2723_v32 }
 0x648   : > { %1833 = vmatpush.bf16.msrb.mxu0 %v2687_v54  ;;  %v2999_v54 = vld [vmem:[#allocation18 + $0x60] sm:$0xff] }
 0x64a   : > { %1820 = vmatpush.bf16.msra.mxu3 %v2667_v0  ;;  %v3003_v0 = vld [vmem:[#allocation18 + $0x80] sm:$0xff] }
 0x64b   : > { %1846 = vmatpush.bf16.msra.mxu1 %v2707_v36  ;;  %v3016_v36 = vld [vmem:[#allocation18 + $0xe8] sm:$0xff] }
 0x64c   : > { %1834 = vmatpush.bf16.msrb.mxu0 %v2671_v3  ;;  %v2996_v3 = vld [vmem:[#allocation18 + $0x48] sm:$0xff] }
 0x64e   : > { %2205 = vmatpush.bf16.msrb.mxu3 %v3002_v44 }
 0x64f   : > { %1847 = vmatpush.bf16.msra.mxu1 %v2691_v59  ;;  %v3004_v59 = vld [vmem:[#allocation18 + $0x88] sm:$0xff] }
 0x652   : > { %2206 = vmatpush.bf16.msrb.mxu3 %v3001_v19 }
 0x653   : > { %1848 = vmatpush.bf16.msra.mxu1 %v2675_v6 }
 0x656   : > { %2207 = vmatpush.bf16.msrb.mxu3 %v3000_v50 }
 0x657   : > { %2233 = vmatpush.bf16.msrb.mxu1 %v3018_v41 }
 0x65a   : > { %2208 = vmatpush.bf16.msrb.mxu3 %v2999_v54 }
 0x65b   : > { %2234 = vmatpush.bf16.msrb.mxu1 %v3017_v43 }
 0x65f   : > { %2235 = vmatpush.bf16.msrb.mxu1 %v3016_v36 }
 0x663   : > { %2236 = vmatpush.bf16.msrb.mxu1 %v3015_v48 }
 0x6af   : > { %v1557_v52 = vpop.xlane.xlu0 %1556 }
 0x6b0   : > { %v1560_v58 = vmul.f32 %v1557_v52, %v4068_v14  ;;  %v3014_v52 = vld [vmem:[#allocation18 + $0xd8] sm:$0xff] }
 0x6b1   : > { %2237 = vmatpush.bf16.msrb.mxu1 %v3014_v52 }
 0x6b2   : > { %v1562_v2 = vadd.f32 1e-05, %v1560_v58  ;;  %v2998_v58 = vld [vmem:[#allocation18 + $0x58] sm:$0xff] }
 0x6b3   : > { %2209 = vmatpush.bf16.msrb.mxu3 %v2998_v58 }
 0x6b4   : > { %3309 = vrsqrt.f32 %v1562_v2  ;;  %vm1570_vm12 = vweird.f32 %v1562_v2 }
 0x6b5   : > { %2238 = vmatpush.bf16.msrb.mxu1 %v3013_v56 }
 0x6b7   : > { %v1559_v8 = vpop.xlane.xlu1 %1558  ;;  %2210 = vmatpush.bf16.msrb.mxu3 %v2997_v63 }
 0x6b8   : > { %v1561_v21 = vmul.f32 %v1559_v8, %v4068_v14 }
 0x6b9   : > { %2239 = vmatpush.bf16.msrb.mxu1 %v3012_v60 }
 0x6ba   : > { %v3310_v9 = vpop.eup %3309  ;;  %v1563_v10 = vadd.f32 1e-05, %v1561_v21 }
 0x6bb   : > { %v1565_v11 = vmul.f32 %v3310_v9, %v1562_v2  ;;  %vm1571_vm11 = vweird.f32 %v3310_v9  ;;  %v2988_v2 = vld [vmem:[#allocation18 + $0x8] sm:$0xff]  ;;  %2211 = vmatpush.bf16.msrb.mxu3 %v2996_v3 }
 0x6bc   : > { %3311 = vrsqrt.f32 %v1563_v10  ;;  %vm1572_vm13 = vmor %vm1570_vm12, %vm1571_vm11  ;;  %vm1580_vm15 = vweird.f32 %v1563_v10 }
 0x6bd   : > { %v1566_v12 = vmul.f32 %v3310_v9, %v1565_v11  ;;  %2240 = vmatpush.bf16.msrb.mxu1 %v3011_v17 }
 0x6bf   : > { %v1567_v13 = vmul.f32 0.5, %v1566_v12 }
 0x6c1   : > { %v1568_v15 = vsub.f32 1.5, %v1567_v13  ;;  %v2987_v13 = vld [vmem:[#allocation18] sm:$0xff] }
 0x6c2   : > { %v3312_v16 = vpop.eup %3311 }
 0x6c3   : > { %v1569_v18 = vmul.f32 %v3310_v9, %v1568_v15  ;;  %v1575_v20 = vmul.f32 %v3312_v16, %v1563_v10  ;;  %vm1581_vm14 = vweird.f32 %v3312_v16  ;;  %v1632_v10 = vperm.slane %v4177_v61, 1  ;;  %v2995_v15 = vld [vmem:[#allocation18 + $0x40] sm:$0xff] }
 0x6c4   : > { %vm1582_vm0 = vmor %vm1580_vm15, %vm1581_vm14  ;;  %2212 = vmatpush.bf16.msrb.mxu3 %v2995_v15 }
 0x6c5   : > { %v1576_v23 = vmul.f32 %v3312_v16, %v1575_v20  ;;  %v1573_v24 = vsel %vm1572_vm13, %v3310_v9, %v1569_v18  ;;  %v1631_v9 = vperm.slane %v4177_v61, 0 }
 0x6c6   : > { %v1584_v30 = vmul.f32 %v1573_v24, %v4154_v29  ;;  %v3010_v29 = vld [vmem:[#allocation18 + $0xb8] sm:$0xff] }
 0x6c7   : > { %v1577_v26 = vmul.f32 0.5, %v1576_v23  ;;  %2219 = vmatpush.bf16.msra.mxu0 %v3010_v29 }
 0x6c8   : > { %v1589_v33 = vmul.f32 %v3266_v4, %v1584_v30 }
 0x6c9   : > { %v1578_v27 = vsub.f32 1.5, %v1577_v26 }
 0x6ca   : > { %v1594_v38 = vadd.f32 %v3267_v35, %v1589_v33 }
 0x6cb   : > { %v1579_v28 = vmul.f32 %v3312_v16, %v1578_v27  ;;  %2220 = vmatpush.bf16.msra.mxu0 %v3009_v42 }
 0x6cd   : > { %v1583_v7 = vsel %vm1582_vm0, %v3312_v16, %v1579_v28 }
 0x6ce   : > { %v1585_v32 = vmul.f32 %v1583_v7, %v4160_v31  ;;  %v2994_v31 = vld [vmem:[#allocation18 + $0x38] sm:$0xff] }
 0x6cf   : > { %2191 = vmatpush.bf16.msra.mxu2 %v2994_v31  ;;  %2221 = vmatpush.bf16.msra.mxu0 %v3008_v45 }
 0x6d0   : > { %v1590_v37 = vmul.f32 %v3266_v4, %v1585_v32 }
 0x6d2   : > { %v1595_v39 = vadd.f32 %v3267_v35, %v1590_v37 }
 0x6d3   : > { %2192 = vmatpush.bf16.msra.mxu2 %v2993_v46  ;;  %2222 = vmatpush.bf16.msra.mxu0 %v3007_v47 }
 0x6d4   : > { %v1596_v40 = vpack.c.bf16 %v1595_v39, %v1594_v38 }
 0x6d6   : > { %1807 = vmatmul.bf16.vlgmr.msrb.gmra.mxu2 %v1596_v40  ;;  %1821 = vmatmul.bf16.vlgmr.msra.gmra.mxu3 %v1596_v40 }
 0x6d7   : > { %1835 = vmatmul.bf16.vlgmr.msrb.gmra.mxu0 %v1596_v40  ;;  %1849 = vmatmul.bf16.vlgmr.msra.gmra.mxu1 %v1596_v40 }
 0x6d8   : > { %2193 = vmatpush.bf16.msra.mxu2 %v2992_v49  ;;  %2223 = vmatpush.bf16.msra.mxu0 %v3006_v51 }
 0x6dc   : > { %2194 = vmatpush.bf16.msra.mxu2 %v2991_v53  ;;  %2224 = vmatpush.bf16.msra.mxu0 %v3005_v55 }
 0x6e0   : > { %2195 = vmatpush.bf16.msra.mxu2 %v2990_v57  ;;  %2225 = vmatpush.bf16.msra.mxu0 %v3004_v59 }
 0x6e4   : > { %2196 = vmatpush.bf16.msra.mxu2 %v2989_v62  ;;  %2226 = vmatpush.bf16.msra.mxu0 %v3003_v0 }
 0x6e8   : > { %2197 = vmatpush.bf16.msra.mxu2 %v2988_v2 }
 0x6ec   : > { %2198 = vmatpush.bf16.msra.mxu2 %v2987_v13 }
 0x754   : > { %v1836_v5 = vpop.f32.mrf.mxu0  ;;  %v1850_v6 = vpop.f32.mrf.mxu1 }
 0x755   : > { %v4181_v8 = vadd.f32 %v1836_v5, %v1633_v34  ;;  %v4183_v21 = vadd.f32 %v1850_v6, %v1634_v1 }
 0x757   : > { %v1865_v11 = vmul.f32 0.044715, %v4181_v8  ;;  %v1866_v12 = vmul.f32 0.044715, %v4183_v21  ;;  %v1857_v13 = vmul.f32 0.5, %v4181_v8 }
 0x759   : > { %v1873_v16 = vmul.f32 %v1865_v11, %v4181_v8  ;;  %v1874_v18 = vmul.f32 %v1866_v12, %v4183_v21  ;;  %v1808_v20 = vpop.f32.mrf.mxu2  ;;  %v1822_v23 = vpop.f32.mrf.mxu3 }
 0x75a   : > { %v4191_v24 = vadd.f32 %v1808_v20, %v1631_v9  ;;  %v4193_v26 = vadd.f32 %v1822_v23, %v1632_v10  ;;  %v1858_v20 = vmul.f32 0.5, %v4183_v21 }
 0x75b   : > { %v1881_v27 = vmul.f32 %v1873_v16, %v4181_v8  ;;  %v1882_v30 = vmul.f32 %v1874_v18, %v4183_v21 }
 0x75c   : > { %v1863_v4 = vmul.f32 0.044715, %v4191_v24  ;;  %v1864_v28 = vmul.f32 0.044715, %v4193_v26  ;;  %v1838_v7 = vpop.f32.mrf.mxu0  ;;  %v1852_v32 = vpop.f32.mrf.mxu1 }
 0x75d   : > { %v1889_v33 = vadd.f32 %v1881_v27, %v4181_v8  ;;  %v1839_v35 = vadd.f32 %v1838_v7, %v1633_v34  ;;  %v1853_v37 = vadd.f32 %v1852_v32, %v1634_v1  ;;  %v1890_v38 = vadd.f32 %v1882_v30, %v4183_v21 }
 0x75e   : > { %v1871_v39 = vmul.f32 %v1863_v4, %v4191_v24  ;;  %v1872_v40 = vmul.f32 %v1864_v28, %v4193_v26 }
 0x75f   : > { %v1869_v29 = vmul.f32 0.044715, %v1839_v35  ;;  %v1870_v43 = vmul.f32 0.044715, %v1853_v37  ;;  %v1897_v31 = vmul.f32 0.7978846, %v1889_v33 }
 0x760   : > { %v1879_v41 = vmul.f32 %v1871_v39, %v4191_v24  ;;  %v1880_v42 = vmul.f32 %v1872_v40, %v4193_v26  ;;  %v1898_v46 = vmul.f32 0.7978846, %v1890_v38  ;;  %v1861_v15 = vmul.f32 0.5, %v1839_v35 }
 0x761   : > { %v1877_v44 = vmul.f32 %v1869_v29, %v1839_v35  ;;  %v1810_v45 = vpop.f32.mrf.mxu2  ;;  %v1824_v36 = vpop.f32.mrf.mxu3  ;;  %v1878_v47 = vmul.f32 %v1870_v43, %v1853_v37  ;;  %3313 = vtanh.f32 %v1897_v31  ;;  %v1862_v23 = vmul.f32 0.5, %v1853_v37 }
 0x762   : > { %v1887_v19 = vadd.f32 %v1879_v41, %v4191_v24  ;;  %v1811_v48 = vadd.f32 %v1810_v45, %v1631_v9  ;;  %v1888_v49 = vadd.f32 %v1880_v42, %v4193_v26  ;;  %v1825_v51 = vadd.f32 %v1824_v36, %v1632_v10 }
 0x763   : > { %v1885_v50 = vmul.f32 %v1877_v44, %v1839_v35  ;;  %v1886_v53 = vmul.f32 %v1878_v47, %v1853_v37  ;;  %3315 = vtanh.f32 %v1898_v46  ;;  %v1855_v41 = vmul.f32 0.5, %v4191_v24  ;;  %v3268_v24 = vld [vmem:[%s4340_s11] ss:$0 sm:$0xff] }
 0x764   : > { %v1895_v52 = vmul.f32 0.7978846, %v1887_v19  ;;  %v1867_v54 = vmul.f32 0.044715, %v1811_v48  ;;  %v1868_v56 = vmul.f32 0.044715, %v1825_v51 }
 0x765   : > { %v1893_v55 = vadd.f32 %v1885_v50, %v1839_v35  ;;  %v1894_v57 = vadd.f32 %v1886_v53, %v1853_v37  ;;  %v1896_v59 = vmul.f32 0.7978846, %v1888_v49  ;;  %v1859_v8 = vmul.f32 0.5, %v1811_v48 }
 0x766   : > { %v1875_v58 = vmul.f32 %v1867_v54, %v1811_v48  ;;  %v1876_v61 = vmul.f32 %v1868_v56, %v1825_v51  ;;  %3317 = vtanh.f32 %v1895_v52  ;;  %v1856_v42 = vmul.f32 0.5, %v4193_v26 }
 0x767   : > { %v1901_v60 = vmul.f32 0.7978846, %v1893_v55  ;;  %v1902_v62 = vmul.f32 0.7978846, %v1894_v57  ;;  %v3314_v34 = vpop.eup %3313  ;;  %v1860_v21 = vmul.f32 0.5, %v1825_v51 }
 0x768   : > { %v1883_v63 = vmul.f32 %v1875_v58, %v1811_v48  ;;  %v1884_v0 = vmul.f32 %v1876_v61, %v1825_v51  ;;  %v1913_v9 = vadd.f32 1.0, %v3314_v34 }
 0x769   : > { %3319 = vtanh.f32 %v1901_v60  ;;  %v3316_v2 = vpop.eup %3315 }
 0x76a   : > { %v1891_v17 = vadd.f32 %v1883_v63, %v1811_v48  ;;  %3321 = vtanh.f32 %v1902_v62  ;;  %v1892_v1 = vadd.f32 %v1884_v0, %v1825_v51  ;;  %v1914_v11 = vadd.f32 1.0, %v3316_v2 }
 0x76b   : > { %3323 = vtanh.f32 %v1896_v59  ;;  %v1921_v30 = vmul.f32 %v1913_v9, %v1857_v13 }
 0x76c   : > { %v1899_v3 = vmul.f32 0.7978846, %v1891_v17  ;;  %v1900_v5 = vmul.f32 0.7978846, %v1892_v1  ;;  %v3318_v6 = vpop.eup %3317  ;;  %v1922_v28 = vmul.f32 %v1914_v11, %v1858_v20 }
 0x76d   : > { %v1911_v32 = vadd.f32 1.0, %v3318_v6 }
 0x76e   : > { %3325 = vtanh.f32 %v1899_v3 }
 0x76f   : > { %v3320_v10 = vpop.eup %3319  ;;  %3327 = vtanh.f32 %v1900_v5  ;;  %v1919_v43 = vmul.f32 %v1911_v32, %v1855_v41 }
 0x770   : > { %v3322_v12 = vpop.eup %3321  ;;  %v1917_v16 = vadd.f32 1.0, %v3320_v10 }
 0x771   : > { %v3324_v18 = vpop.eup %3323  ;;  %v1918_v27 = vadd.f32 1.0, %v3322_v12 }
 0x772   : > { %v1925_v4 = vmul.f32 %v1917_v16, %v1861_v15  ;;  %v1912_v39 = vadd.f32 1.0, %v3324_v18 }
 0x773   : > { %v1926_v7 = vmul.f32 %v1918_v27, %v1862_v23 }
 0x774   : > { %v3326_v33 = vpop.eup %3325  ;;  %v1929_v38 = vpack.c.bf16 %v1925_v4, %v1921_v30  ;;  %v1920_v44 = vmul.f32 %v1912_v39, %v1856_v42  ;;  %v3269_v30 = vld [vmem:[%s4341_s9] ss:$0 sm:$0xff] }
 0x775   : > { %v3328_v40 = vpop.eup %3327  ;;  %v1930_v29 = vpack.c.bf16 %v1926_v7, %v1922_v28  ;;  %v1915_v35 = vadd.f32 1.0, %v3326_v33 }
 0x776   : > { %2227 = vmatmul.bf16.vlgmr.msra.gmra.mxu0 %v1929_v38  ;;  %v1916_v37 = vadd.f32 1.0, %v3328_v40 }
 0x777   : > { %2241 = vmatmul.bf16.vlgmr.msrb.gmra.mxu1 %v1930_v29  ;;  %v1923_v31 = vmul.f32 %v1915_v35, %v1859_v8 }
 0x778   : > { %v1924_v45 = vmul.f32 %v1916_v37, %v1860_v21 }
 0x779   : > { %v1927_v36 = vpack.c.bf16 %v1923_v31, %v1919_v43 }
 0x77a   : > { %v1928_v46 = vpack.c.bf16 %v1924_v45, %v1920_v44 }
 0x77b   : > { %2199 = vmatmul.bf16.vlgmr.msra.gmra.mxu2 %v1927_v36 }
 0x77c   : > { %2213 = vmatmul.bf16.vlgmr.msrb.gmra.mxu3 %v1928_v46 }
 0x7f3   : > { %v2228_v49 = vpop.f32.mrf.mxu0 }
 0x7f4   : > { %v2242_v50 = vpop.f32.mrf.mxu1 }
 0x7fb   : > { %v2230_v58 = vpop.f32.mrf.mxu0 }
 0x7fc   : > { %v2244_v60 = vpop.f32.mrf.mxu1 }
 0x7fe   : > { %v2200_v19 = vpop.f32.mrf.mxu2 }
 0x7ff   : > { %v2201_v47 = vadd.f32 %v3268_v24, %v2200_v19  ;;  %v2214_v48 = vpop.f32.mrf.mxu3 }
 0x801   : > { %v2215_v26 = vadd.f32 %v2214_v48, %v2201_v47 }
 0x803   : > { %v2229_v51 = vadd.f32 %v2228_v49, %v2215_v26 }
 0x805   : > { %v2243_v52 = vadd.f32 %v2242_v50, %v2229_v51 }
 0x806   : > { %v2202_v53 = vpop.f32.mrf.mxu2 }
 0x807   : > { %v2203_v54 = vadd.f32 %v3268_v24, %v2202_v53  ;;  %v2247_v55 = vadd.f32 %v2243_v52, %v4145_v22  ;;  %v2216_v56 = vpop.f32.mrf.mxu3 }
 0x809   : > { %v2217_v57 = vadd.f32 %v2216_v56, %v2203_v54  ;;  %2251 = vadd.xlane.f32.xlu2 %v2247_v55 }
 0x80b   : > { %v2231_v59 = vadd.f32 %v2230_v58, %v2217_v57 }
 0x80d   : > { %v2245_v61 = vadd.f32 %v2244_v60, %v2231_v59 }
 0x80f   : > { %v2248_v62 = vadd.f32 %v2245_v61, %v4149_v25 }
 0x811   : > { %2253 = vadd.xlane.f32.xlu0 %v2248_v62 }
 0x87c   : > { %v2252_v63 = vpop.xlane.xlu2 %2251 }
 0x87d   : > { %v2255_v0 = vmul.f32 %v2252_v63, %v4068_v14 }
 0x87f   : > { %v2257_v17 = vsub.f32 %v2247_v55, %v2255_v0 }
 0x881   : > { %v2259_v34 = vmul.f32 %v2257_v17, %v2257_v17 }
 0x883   : > { %2261 = vadd.xlane.f32.xlu1 %v2259_v34 }
 0x884   : > { %v2254_v1 = vpop.xlane.xlu0 %2253 }
 0x885   : > { %v2256_v2 = vmul.f32 %v2254_v1, %v4068_v14 }
 0x887   : > { %v2258_v22 = vsub.f32 %v2248_v62, %v2256_v2 }
 0x889   : > { %v2260_v3 = vmul.f32 %v2258_v22, %v2258_v22 }
 0x88b   : > { %2263 = vadd.xlane.f32.xlu2 %v2260_v3 }
 0x8f6   : > { %v2262_v5 = vpop.xlane.xlu1 %2261 }
 0x8f7   : > { %v2265_v6 = vmul.f32 %v2262_v5, %v4068_v14 }
 0x8f9   : > { %v2267_v9 = vadd.f32 1e-05, %v2265_v6 }
 0x8fb   : > { %3329 = vrsqrt.f32 %v2267_v9  ;;  %vm2275_vm2 = vweird.f32 %v2267_v9 }
 0x8fe   : > { %v2264_v10 = vpop.xlane.xlu2 %2263 }
 0x8ff   : > { %v2266_v25 = vmul.f32 %v2264_v10, %v4068_v14  ;;  %v3270_v14 = vld [vmem:[%s4342_s21] ss:$0 sm:$0xff] }
 0x901   : > { %v3330_v11 = vpop.eup %3329  ;;  %v2268_v12 = vadd.f32 1e-05, %v2266_v25 }
 0x902   : > { %v2270_v13 = vmul.f32 %v3330_v11, %v2267_v9  ;;  %vm2276_vm1 = vweird.f32 %v3330_v11 }
 0x903   : > { %3331 = vrsqrt.f32 %v2268_v12  ;;  %vm2277_vm3 = vmor %vm2275_vm2, %vm2276_vm1  ;;  %vm2285_vm5 = vweird.f32 %v2268_v12 }
 0x904   : > { %v2271_v15 = vmul.f32 %v3330_v11, %v2270_v13 }
 0x906   : > { %v2272_v16 = vmul.f32 0.5, %v2271_v15 }
 0x908   : > { %v2273_v18 = vsub.f32 1.5, %v2272_v16 }
 0x909   : > { %v3332_v20 = vpop.eup %3331 }
 0x90a   : > { %v2274_v23 = vmul.f32 %v3330_v11, %v2273_v18  ;;  %v2280_v27 = vmul.f32 %v3332_v20, %v2268_v12  ;;  %vm2286_vm4 = vweird.f32 %v3332_v20 }
 0x90b   : > { %vm2287_vm6 = vmor %vm2285_vm5, %vm2286_vm4 }
 0x90c   : > { %v2278_v4 = vsel %vm2277_vm3, %v3330_v11, %v2274_v23  ;;  %v2281_v28 = vmul.f32 %v3332_v20, %v2280_v27 }
 0x90d   : > { %v2289_v7 = vmul.f32 %v2278_v4, %v2257_v17 }
 0x90e   : > { %v2282_v32 = vmul.f32 0.5, %v2281_v28 }
 0x90f   : > { %v2294_v33 = vmul.f32 %v3269_v30, %v2289_v7 }
 0x910   : > { %v2283_v38 = vsub.f32 1.5, %v2282_v32 }
 0x911   : > { %v2299_v39 = vadd.f32 %v3270_v14, %v2294_v33 }
 0x912   : > { %v2284_v40 = vmul.f32 %v3332_v20, %v2283_v38 }
 0x913   : > { %2301 = vst [vmem:[#allocation2] sm:$0xff] %v2299_v39 }
 0x914   : > { %v2288_v29 = vsel %vm2287_vm6, %v3332_v20, %v2284_v40 }
 0x915   : > { %v2290_v41 = vmul.f32 %v2288_v29, %v2258_v22 }
 0x917   : > { %v2295_v8 = vmul.f32 %v3269_v30, %v2290_v41  ;;  %2306 = sbr.rel (%p2916_p1) target bundleno = 2334 (0x91e), region = 136 }
 0x919   : > { %v2300_v35 = vadd.f32 %v3270_v14, %v2295_v8 }
 0x91b   : > { %2302 = vst [vmem:[#allocation2 + $0x8] sm:$0xff] %v2300_v35 }
 0x91c   : > { %2307 = vst [vmem:[%s4059_s7] sm:$0xff] %v2299_v39 }
 0x91d   : > { %2308 = vst [vmem:[%s4059_s7 + $0x8] sm:$0xff] %v2300_v35 }
 0x91e PF: > { %s4344_s12 = sld [smem:[#allocation29_spill]]  ;;  %s2322_s4 = sshll.u32 %s4059_s7, 4  ;;  %s2323_s4 = int_to_ptr.vmem [resolvable:$true] %s2322_s4 }
 0x91f   : > { %s4345_s18 = sld [smem:[#allocation46_spill]]  ;;  %s2310_s8 = scalar_lea.sflag [#allocation5], %s4031_s15 }
 0x924   : > { %s3019_s27 = sshll.u32 %s4344_s12, 4 }
 0x925   : > { %s2321_s5 = scalar_lea.hbm %s4345_s18, %s3019_s27  ;;  %s3653_s16 = scalar_lea.hbm %s4345_s18, 32 }
 0x926   : > { %s2324_s28 = sshll.u32 %s2321_s5, 4  ;;  %s2325_s28 = int_to_ptr.hbm [resolvable:$true] %s2324_s28 }
 0x927   : > { %s3647_s11 = sshra.s32 %s2325_s28, 4  ;;  %s3648_s11 = int_to_ptr.hbm [resolvable:$true] %s3647_s11 }
 0x928   : > { %s3649_s19 = scalar_lea.hbm %s3648_s11, 16  ;;  %p3654_p11 = scmp.lt.s32.totalorder %s3648_s11, %s4345_s18 }
 0x929   : > { %p3650_p8 = scmp.ne.s32.totalorder %s3648_s11, %s3649_s19  ;;  %p3655_p12 = scmp.lt.s32.totalorder %s3653_s16, %s3649_s19 }
 0x92b   : > { %p3651_p9 = pnand %p3650_p8, %p4004_p2  ;;  %p3656_p13 = por %p3655_p12, %p3654_p11 }
 0x92d   : > { %p3652_p10 = pneg %p3651_p9 }
 0x92f   : > { %p3657_p0 = pnand %p3656_p13, %p3652_p10 }
 0x931   : > { %3660 = shalt.err (!%p3657_p0)
}
 0x932   : > { %s3774_s15 = smov 128   ;;  %s3775_s7 = smov 8  }
 0x933   : > { %3058 = dma.vmem_to_hbm [thread:$0]  (%p4004_p2), %s2323_s4, 256, %s2325_s28, %s2310_s8, %s3774_s15, %s3774_s15, %s3775_s7  }
 0x934 PF: > { %p3115_p5 = scmp.ge.s32.totalorder %s3751_s30, 2  ;;  %s2339_s10 = sand.u32 1, %s3723_s24  }
 0x935   : > { %s2340_s12 = scalar_lea.sflag [#allocation5], %s2339_s10 }
 0x936   : > { %p3093_p6 = pnand %p3115_p5, %p4008_p4 }
 0x938   : > { %p3094_p7 = pneg %p3093_p6 }
 0x93a   : > { %3718 = dma.done.wait (%p3094_p7), %s2340_s12, 256  }
 0x93b   : > { %3720 = vsyncadd (%p3094_p7), %s2340_s12, 4294967040  ;;  %s38_s30 = sadd.s32 1, %s3751_s30   ;;  %s4346_s24 = smov %s3727_s25 }
 0x93c   : > { %p35_p3 = scmp.ge.s32.totalorder %s38_s30, 10   ;;  %s4347_s25 = smov %s3731_s26 }
 0x93d   : > { %s4348_s26 = smov %s4017_s1  ;;  %s4349_s27 = smov %s3743_s29 }
 0x93e   : > { %s4350_s28 = smov %s3747_s0  ;;  %s4351_s29 = smov %s4354_s20 }
 0x93f   : > { %s4352_s0 = smov %s4358_s2  ;;  %37 = sbr.rel (!%p35_p3) target bundleno = 30 (0x1e), region = 177 }
 0x944   :  { %2346 = vsyncpa [#allocation4], 1 }
 0x945   :  { %2348 = vsyncpa [#allocation4 + $0x1], 1 }
 0x946   :  { %2349 = vsyncpa [#allocation7], 1 }
 0x947   :  { %2350 = vsyncpa [#allocation10], 1 }
 0x948   :  { %2351 = vsyncpa [#allocation13], 1 }
 0x949   :  { %2352 = vsyncpa [#allocation16], 1 }
 0x94a   :  { %2353 = vsyncpa [#allocation19], 1 }
 0x94b   :  { %2354 = vsyncpa [#allocation5], 1 }
 0x94c   :  { %2356 = vsyncpa [#allocation5 + $0x1], 1 }

</bundles_post_ra>
